<compile_context>
chip_gen: v7x
topology: tpu7x:2x2x1
jax: 0.10.0
libtpu: 0.0.40
codegen_flags: <defaults>
</compile_context>

<pallas_src>
import numpy as np
import jax
import jax.numpy as jnp
from jax import lax
from jax.experimental import pallas as pl
from jax.experimental.pallas import tpu as pltpu

C_PAD = 128  # lane-padded per-anchor channel dimension


def _make_yolo_kernel(tm: int, w_img: int):
    w_f = float(w_img)

    def kernel(x_ref, w_ref, c_ref, mm_ref, o_ref):
        c = c_ref[...]                    # (8, 128) packed per-anchor constants
        bias  = c[0:1, :]
        msig  = c[1:2, :]  # sigmoid channels, pre-scaled (stride on x/y, 1 elsewhere)
        mexp  = c[2:3, :]  # exp channels, pre-scaled (anchor_w/h * stride on w/h)
        addx  = c[3:4, :]  # stride at the x channel
        addy  = c[4:5, :]  # stride at the y channel
        mkeep = c[5:6, :]  # 1 on the n_ch prediction channels
        msxy  = c[6:7, :]  # stride at the sigma-x/y channels (gaussian)
        mswh  = c[7:8, :]  # 1 at the sigma-w/h channels (gaussian)

        # 1x1 conv == matmul over channels (output lanes padded to 128).
        y = jnp.dot(x_ref[...], w_ref[...], preferred_element_type=jnp.float32) + bias

        # One sigmoid over all channels; exp only where it is actually used
        # (masking before exp avoids inf * 0 = NaN on sigmoid-only channels).
        s = jax.nn.sigmoid(y)
        e = jnp.exp(jnp.where(mexp > 0.0, y, 0.0))

        # In-kernel grid shifts: rows inside one image are (h, w) row-major.
        r = (lax.broadcasted_iota(jnp.int32, (tm, C_PAD), 0)
             + pl.program_id(1) * tm).astype(jnp.float32)
        ys = jnp.floor(r / w_f)
        xs = r - ys * w_f

        # box decode: (sigmoid(tx)+i)*stride, (sigmoid(ty)+j)*stride,
        #             exp(tw)*anchor_w*stride, exp(th)*anchor_h*stride,
        #             sigmoid(conf/cls/sigma).
        dec = msig * s + mexp * e + addx * xs + addy * ys

        # Fused Gaussian-YOLO post-processing (all terms vanish when masks are 0):
        #   conf *= 1 - mean(sigma);  sigma -> sqrt;  sigma_xy *= stride;
        #   sigma_wh -> exp(sqrt(sigma_wh)).
        sm = jnp.dot(dec, mm_ref[...], preferred_element_type=jnp.float32)
        dec = dec * (1.0 - sm)
        sig_sqrt = jnp.sqrt(jnp.where((msxy + mswh) > 0.0, dec, 0.0))
        sig_out = msxy * sig_sqrt + mswh * jnp.exp(jnp.where(mswh > 0.0, sig_sqrt, 0.0))

        o_ref[...] = dec * mkeep + sig_out

    return kernel


class YOLOLayerPallas:
    def __init__(self, config_model, layer_no, in_ch, ignore_thre=0.7, seed=0):
        strides = [32, 16, 8]
        self.anchors = config_model['ANCHORS']
        self.anch_mask = config_model['ANCH_MASK'][layer_no]
        self.n_anchors = len(self.anch_mask)
        self.n_classes = config_model['N_CLASSES']
        self.gaussian = config_model['GAUSSIAN']
        self.ignore_thre = ignore_thre
        self.stride = strides[layer_no]
        all_anchors_grid = [(w / self.stride, h / self.stride) for w, h in self.anchors]
        self.masked_anchors = [all_anchors_grid[i] for i in self.anch_mask]
        self.channels_per_anchor = 5 + self.n_classes + (4 if self.gaussian else 0)
        assert self.channels_per_anchor <= C_PAD
        self.in_ch = in_ch
        c_out = self.channels_per_anchor * self.n_anchors
        # deterministic synthetic parameters (nn.Conv2d(in_ch, c_out, 1))
        kw, kb = jax.random.split(jax.random.PRNGKey(seed))
        self.weight = (jax.random.normal(kw, (c_out, in_ch), jnp.float32) * 0.05)
        self.bias = (jax.random.normal(kb, (c_out,), jnp.float32) * 0.01)
        self._w_pad, self._consts, self._mmean = self._build_constants()

    def _build_constants(self):
        A, cpa = self.n_anchors, self.channels_per_anchor
        n_ch = 5 + self.n_classes
        stride = float(self.stride)
        wT = np.asarray(self.weight).T            # (C_in, c_out)
        b = np.asarray(self.bias)

        w_pad = np.zeros((A, self.in_ch, C_PAD), np.float32)
        consts = np.zeros((A, 8, C_PAD), np.float32)
        mmean = np.zeros((C_PAD, C_PAD), np.float32)

        k = np.arange(cpa)
        msig = np.where((k == 0) | (k == 1), stride,
                        np.where(k >= 4, 1.0, 0.0)).astype(np.float32)
        addx = np.where(k == 0, stride, 0.0).astype(np.float32)
        addy = np.where(k == 1, stride, 0.0).astype(np.float32)
        mkeep = (k < n_ch).astype(np.float32)
        msxy = np.zeros(cpa, np.float32)
        mswh = np.zeros(cpa, np.float32)
        if self.gaussian:
            msxy[n_ch:n_ch + 2] = stride
            mswh[n_ch + 2:n_ch + 4] = 1.0
            mmean[n_ch:n_ch + 4, 4] = 0.25        # sigma mean lands on the conf lane

        for a in range(A):
            cols = slice(a * cpa, (a + 1) * cpa)
            w_pad[a, :, :cpa] = wT[:, cols]
            consts[a, 0, :cpa] = b[cols]
            consts[a, 1, :cpa] = msig
            mexp = np.zeros(cpa, np.float32)
            mexp[2] = self.masked_anchors[a][0] * stride
            mexp[3] = self.masked_anchors[a][1] * stride
            consts[a, 2, :cpa] = mexp
            consts[a, 3, :cpa] = addx
            consts[a, 4, :cpa] = addy
            consts[a, 5, :cpa] = mkeep
            consts[a, 6, :cpa] = msxy
            consts[a, 7, :cpa] = mswh

        return jnp.asarray(w_pad), jnp.asarray(consts), jnp.asarray(mmean)

    @staticmethod
    def _pick_tile(hw, cap=2048):
        if hw <= cap:
            return hw                     # full-extent block is always legal
        d = (cap // 8) * 8
        while d >= 8:
            if hw % d == 0:
                return d
            d -= 8
        return hw                         # no 8-aligned divisor: keep full extent

    def __call__(self, xin):
        """Inference path (labels=None) of YOLOLayer.forward. xin: (N, C, H, W)."""
        N, C, H, W = xin.shape
        assert C == self.in_ch and H == W
        A, cpa = self.n_anchors, self.channels_per_anchor
        HW = H * W
        tm = self._pick_tile(HW)
        T = HW // tm

        x3d = jnp.transpose(xin, (0, 2, 3, 1)).reshape(N, HW, C).astype(jnp.float32)

        out = pl.pallas_call(
            _make_yolo_kernel(tm, W),
            out_shape=jax.ShapeDtypeStruct((N, A, HW, C_PAD), jnp.float32),
            grid=(N, T, A),
            in_specs=[
                pl.BlockSpec((None, tm, C), lambda n, t, a: (n, t, 0)),       # x rows
                pl.BlockSpec((None, C, C_PAD), lambda n, t, a: (a, 0, 0)),    # per-anchor W
                pl.BlockSpec((None, 8, C_PAD), lambda n, t, a: (a, 0, 0)),    # packed consts
                pl.BlockSpec((C_PAD, C_PAD), lambda n, t, a: (0, 0)),         # sigma-mean mat
            ],
            out_specs=pl.BlockSpec((None, None, tm, C_PAD),
                                   lambda n, t, a: (n, a, t, 0)),
            compiler_params=pltpu.CompilerParams(
                dimension_semantics=("parallel", "parallel", "arbitrary")),
        )(x3d, self._w_pad, self._consts, self._mmean)

        # (N, A, HW, 128) -> (N, A*HW, cpa): free reshape + lane slice, no transpose.
        return out.reshape(N, A * HW, C_PAD)[..., :cpa]


def _reference(layer, xin):
    """Pure-JAX mirror of the PyTorch forward (labels=None) for validation."""
    N, C, H, W = xin.shape
    A, cpa = layer.n_anchors, layer.channels_per_anchor
    n_ch = 5 + layer.n_classes
    out = jnp.einsum('nchw,oc->nohw', xin, layer.weight) + layer.bias[None, :, None, None]
    out = out.reshape(N, A, cpa, H, W).transpose(0, 1, 3, 4, 2)
    if layer.gaussian:
        sigma = jax.nn.sigmoid(out[..., -4:])
        out = out[..., :-4]
    idx = np.r_[:2, 4:n_ch]
    out = out.at[..., idx].set(jax.nn.sigmoid(out[..., idx]))
    x_shift = jnp.broadcast_to(jnp.arange(W, dtype=jnp.float32), (N, A, H, W))
    y_shift = jnp.broadcast_to(jnp.arange(H, dtype=jnp.float32)[:, None], (N, A, H, W))
    ma = jnp.asarray(layer.masked_anchors, jnp.float32)
    wa = jnp.broadcast_to(ma[:, 0].reshape(1, A, 1, 1), (N, A, H, W))
    ha = jnp.broadcast_to(ma[:, 1].reshape(1, A, 1, 1), (N, A, H, W))
    pred = out
    pred = pred.at[..., 0].add(x_shift)
    pred = pred.at[..., 1].add(y_shift)
    pred = pred.at[..., 2].set(jnp.exp(pred[..., 2]) * wa)
    pred = pred.at[..., 3].set(jnp.exp(pred[..., 3]) * ha)
    pred = pred.at[..., :4].multiply(float(layer.stride))
    pred = pred.reshape(N, -1, n_ch)
    if layer.gaussian:
        sigma = sigma.reshape(N, -1, 4)
        sm = sigma.mean(axis=-1)
        pred = pred.at[..., 4].multiply(1.0 - sm)
        sigma = jnp.sqrt(sigma)
        sigma = jnp.concatenate(
            [sigma[..., :2] * layer.stride, jnp.exp(sigma[..., 2:])], axis=-1)
        pred = jnp.concatenate([pred, sigma], axis=-1)
    return pred


if __name__ == "__main__":
    config_model = {
        'ANCHORS': [(10, 13), (16, 30), (33, 23),
                    (30, 61), (62, 45), (59, 119),
                    (116, 90), (156, 198), (373, 326)],
        'ANCH_MASK': [[6, 7, 8], [3, 4, 5], [0, 1, 2]],
        'N_CLASSES': 2,
        'GAUSSIAN': True,
    }
    layer_no = 2          # stride 8, anch_mask [0, 1, 2]
    in_ch = 32
    layer = YOLOLayerPallas(config_model, layer_no, in_ch, seed=0)

    key = jax.random.PRNGKey(0)
    x = jax.random.normal(key, (2, in_ch, 16, 16), jnp.float32) * 0.5

    pred = layer(x)
    pred = jax.block_until_ready(pred)

    ref = jax.block_until_ready(_reference(layer, x))
    assert pred.shape == ref.shape, (pred.shape, ref.shape)
    np.testing.assert_allclose(np.asarray(pred), np.asarray(ref),
                               rtol=1e-5, atol=1e-5)
    print("KERNEL_OK")
</pallas_src>

<mosaic_0001>
module attributes {stable_mosaic.version = 11 : i64} {
  func.func @kernel(%arg0: i32, %arg1: i32, %arg2: i32, %arg3: memref<1x256x32xf32, #tpu.memory_space<vmem>>, %arg4: memref<1x32x128xf32, #tpu.memory_space<vmem>>, %arg5: memref<1x8x128xf32, #tpu.memory_space<vmem>>, %arg6: memref<128x128xf32, #tpu.memory_space<vmem>>, %arg7: memref<1x1x256x128xf32, #tpu.memory_space<vmem>>) attributes {dimension_semantics = [#tpu.dimension_semantics<parallel>, #tpu.dimension_semantics<parallel>, #tpu.dimension_semantics<arbitrary>], iteration_bounds = array<i64: 2, 1, 3>, scalar_prefetch = 0 : i64, scratch_operands = 0 : i64, tpu.core_type = #tpu.core_type<tc>, window_params = [{transform_indices = @transform_0, window_bounds = array<i64: 1, 256, 32>}, {transform_indices = @transform_1, window_bounds = array<i64: 1, 32, 128>}, {transform_indices = @transform_2, window_bounds = array<i64: 1, 8, 128>}, {pipeline_mode = #tpu.pipeline_mode<synchronous>, transform_indices = @transform_3, window_bounds = array<i64: 128, 128>}, {transform_indices = @transform_4, window_bounds = array<i64: 1, 1, 256, 128>}]} {
    %c0 = arith.constant 0 : index
    %c0_0 = arith.constant 0 : index
    %c0_1 = arith.constant 0 : index
    %0 = vector.load %arg5[%c0, %c0_0, %c0_1] : memref<1x8x128xf32, #tpu.memory_space<vmem>>, vector<1x8x128xf32>
    %1 = vector.shape_cast %0 : vector<1x8x128xf32> to vector<8x128xf32>
    %2 = vector.extract_strided_slice %1 {offsets = [0, 0], sizes = [1, 128], strides = [1, 1]} : vector<8x128xf32> to vector<1x128xf32>
    %3 = vector.extract_strided_slice %1 {offsets = [1, 0], sizes = [1, 128], strides = [1, 1]} : vector<8x128xf32> to vector<1x128xf32>
    %4 = vector.extract_strided_slice %1 {offsets = [2, 0], sizes = [1, 128], strides = [1, 1]} : vector<8x128xf32> to vector<1x128xf32>
    %5 = vector.extract_strided_slice %1 {offsets = [3, 0], sizes = [1, 128], strides = [1, 1]} : vector<8x128xf32> to vector<1x128xf32>
    %6 = vector.extract_strided_slice %1 {offsets = [4, 0], sizes = [1, 128], strides = [1, 1]} : vector<8x128xf32> to vector<1x128xf32>
    %7 = vector.extract_strided_slice %1 {offsets = [5, 0], sizes = [1, 128], strides = [1, 1]} : vector<8x128xf32> to vector<1x128xf32>
    %8 = vector.extract_strided_slice %1 {offsets = [6, 0], sizes = [1, 128], strides = [1, 1]} : vector<8x128xf32> to vector<1x128xf32>
    %9 = vector.extract_strided_slice %1 {offsets = [7, 0], sizes = [1, 128], strides = [1, 1]} : vector<8x128xf32> to vector<1x128xf32>
    %c0_2 = arith.constant 0 : index
    %c0_3 = arith.constant 0 : index
    %c0_4 = arith.constant 0 : index
    %10 = vector.load %arg3[%c0_2, %c0_3, %c0_4] : memref<1x256x32xf32, #tpu.memory_space<vmem>>, vector<1x256x32xf32>
    %11 = vector.shape_cast %10 : vector<1x256x32xf32> to vector<256x32xf32>
    %c0_5 = arith.constant 0 : index
    %c0_6 = arith.constant 0 : index
    %c0_7 = arith.constant 0 : index
    %12 = vector.load %arg4[%c0_5, %c0_6, %c0_7] : memref<1x32x128xf32, #tpu.memory_space<vmem>>, vector<1x32x128xf32>
    %13 = vector.shape_cast %12 : vector<1x32x128xf32> to vector<32x128xf32>
    %cst = arith.constant dense<0.000000e+00> : vector<256x128xf32>
    %14 = tpu.matmul %11, %13, %cst {dimension_numbers = #tpu.dot_dimension_numbers<[1], [0], [0], [1], [0, 0, 1, 1], [], []>} : vector<256x32xf32>, vector<32x128xf32>, vector<256x128xf32> -> vector<256x128xf32>
    %15 = vector.broadcast %2 : vector<1x128xf32> to vector<256x128xf32>
    %16 = arith.addf %14, %15 : vector<256x128xf32>
    %17 = arith.negf %16 : vector<256x128xf32>
    %18 = math.exp %17 : vector<256x128xf32>
    %cst_8 = arith.constant 1.000000e+00 : f32
    %19 = vector.broadcast %cst_8 : f32 to vector<256x128xf32>
    %20 = arith.addf %19, %18 : vector<256x128xf32>
    %21 = arith.divf %19, %20 : vector<256x128xf32>
    %cst_9 = arith.constant 0.000000e+00 : f32
    %22 = vector.broadcast %cst_9 : f32 to vector<1x128xf32>
    %23 = arith.cmpf ogt, %4, %22 : vector<1x128xf32>
    %cst_10 = arith.constant 0.000000e+00 : f32
    %24 = vector.shape_cast %23 : vector<1x128xi1> to vector<1x128xi1>
    %25 = vector.broadcast %24 : vector<1x128xi1> to vector<256x128xi1>
    %26 = vector.broadcast %cst_10 : f32 to vector<256x128xf32>
    %27 = arith.select %25, %16, %26 : vector<256x128xi1>, vector<256x128xf32>
    %28 = math.exp %27 : vector<256x128xf32>
    %29 = tpu.iota {dimensions = array<i32: 0>} : vector<256x128xi32>
    %c256_i32 = arith.constant 256 : i32
    %30 = arith.muli %arg1, %c256_i32 : i32
    %31 = vector.broadcast %30 : i32 to vector<256x128xi32>
    %32 = arith.addi %29, %31 : vector<256x128xi32>
    %33 = arith.sitofp %32 : vector<256x128xi32> to vector<256x128xf32>
    %cst_11 = arith.constant 1.600000e+01 : f32
    %34 = vector.broadcast %cst_11 : f32 to vector<256x128xf32>
    %35 = arith.divf %33, %34 : vector<256x128xf32>
    %36 = math.floor %35 : vector<256x128xf32>
    %cst_12 = arith.constant 1.600000e+01 : f32
    %37 = vector.broadcast %cst_12 : f32 to vector<256x128xf32>
    %38 = arith.mulf %36, %37 : vector<256x128xf32>
    %39 = arith.subf %33, %38 : vector<256x128xf32>
    %40 = vector.broadcast %3 : vector<1x128xf32> to vector<256x128xf32>
    %41 = arith.mulf %40, %21 : vector<256x128xf32>
    %42 = vector.broadcast %4 : vector<1x128xf32> to vector<256x128xf32>
    %43 = arith.mulf %42, %28 : vector<256x128xf32>
    %44 = arith.addf %41, %43 : vector<256x128xf32>
    %45 = vector.broadcast %5 : vector<1x128xf32> to vector<256x128xf32>
    %46 = arith.mulf %45, %39 : vector<256x128xf32>
    %47 = arith.addf %44, %46 : vector<256x128xf32>
    %48 = vector.broadcast %6 : vector<1x128xf32> to vector<256x128xf32>
    %49 = arith.mulf %48, %36 : vector<256x128xf32>
    %50 = arith.addf %47, %49 : vector<256x128xf32>
    %c0_13 = arith.constant 0 : index
    %c0_14 = arith.constant 0 : index
    %51 = vector.load %arg6[%c0_13, %c0_14] : memref<128x128xf32, #tpu.memory_space<vmem>>, vector<128x128xf32>
    %cst_15 = arith.constant dense<0.000000e+00> : vector<256x128xf32>
    %52 = tpu.matmul %50, %51, %cst_15 {dimension_numbers = #tpu.dot_dimension_numbers<[1], [0], [0], [1], [0, 0, 1, 1], [], []>} : vector<256x128xf32>, vector<128x128xf32>, vector<256x128xf32> -> vector<256x128xf32>
    %cst_16 = arith.constant 1.000000e+00 : f32
    %53 = vector.broadcast %cst_16 : f32 to vector<256x128xf32>
    %54 = arith.subf %53, %52 : vector<256x128xf32>
    %55 = arith.mulf %50, %54 : vector<256x128xf32>
    %56 = arith.addf %8, %9 : vector<1x128xf32>
    %cst_17 = arith.constant 0.000000e+00 : f32
    %57 = vector.broadcast %cst_17 : f32 to vector<1x128xf32>
    %58 = arith.cmpf ogt, %56, %57 : vector<1x128xf32>
    %cst_18 = arith.constant 0.000000e+00 : f32
    %59 = vector.shape_cast %58 : vector<1x128xi1> to vector<1x128xi1>
    %60 = vector.broadcast %59 : vector<1x128xi1> to vector<256x128xi1>
    %61 = vector.broadcast %cst_18 : f32 to vector<256x128xf32>
    %62 = arith.select %60, %55, %61 : vector<256x128xi1>, vector<256x128xf32>
    %63 = math.sqrt %62 : vector<256x128xf32>
    %64 = vector.broadcast %8 : vector<1x128xf32> to vector<256x128xf32>
    %65 = arith.mulf %64, %63 : vector<256x128xf32>
    %cst_19 = arith.constant 0.000000e+00 : f32
    %66 = vector.broadcast %cst_19 : f32 to vector<1x128xf32>
    %67 = arith.cmpf ogt, %9, %66 : vector<1x128xf32>
    %cst_20 = arith.constant 0.000000e+00 : f32
    %68 = vector.shape_cast %67 : vector<1x128xi1> to vector<1x128xi1>
    %69 = vector.broadcast %68 : vector<1x128xi1> to vector<256x128xi1>
    %70 = vector.broadcast %cst_20 : f32 to vector<256x128xf32>
    %71 = arith.select %69, %63, %70 : vector<256x128xi1>, vector<256x128xf32>
    %72 = math.exp %71 : vector<256x128xf32>
    %73 = vector.broadcast %9 : vector<1x128xf32> to vector<256x128xf32>
    %74 = arith.mulf %73, %72 : vector<256x128xf32>
    %75 = arith.addf %65, %74 : vector<256x128xf32>
    %76 = vector.broadcast %7 : vector<1x128xf32> to vector<256x128xf32>
    %77 = arith.mulf %55, %76 : vector<256x128xf32>
    %78 = arith.addf %77, %75 : vector<256x128xf32>
    %c0_21 = arith.constant 0 : index
    %c0_22 = arith.constant 0 : index
    %c0_23 = arith.constant 0 : index
    %c0_24 = arith.constant 0 : index
    %79 = vector.load %arg7[%c0_21, %c0_22, %c0_23, %c0_24] : memref<1x1x256x128xf32, #tpu.memory_space<vmem>>, vector<1x1x256x128xf32>
    %80 = vector.shape_cast %79 : vector<1x1x256x128xf32> to vector<256x128xf32>
    %81 = vector.shape_cast %78 : vector<256x128xf32> to vector<1x1x256x128xf32>
    tpu.vector_store %arg7[%c0_21, %c0_22, %c0_23, %c0_24], %81 {strides = array<i32>} : memref<1x1x256x128xf32, #tpu.memory_space<vmem>>, vector<1x1x256x128xf32>,
    return
  }
  func.func @transform_0(%arg0: i32, %arg1: i32, %arg2: i32) -> (i32, i32, i32) {
    %c0_i32 = arith.constant 0 : i32
    %c0_i32_0 = arith.constant 0 : i32
    return %arg0, %arg1, %c0_i32 : i32, i32, i32
  }
  func.func @transform_1(%arg0: i32, %arg1: i32, %arg2: i32) -> (i32, i32, i32) {
    %c0_i32 = arith.constant 0 : i32
    %c0_i32_0 = arith.constant 0 : i32
    %c0_i32_1 = arith.constant 0 : i32
    return %arg2, %c0_i32, %c0_i32_0 : i32, i32, i32
  }
  func.func @transform_2(%arg0: i32, %arg1: i32, %arg2: i32) -> (i32, i32, i32) {
    %c0_i32 = arith.constant 0 : i32
    %c0_i32_0 = arith.constant 0 : i32
    %c0_i32_1 = arith.constant 0 : i32
    return %arg2, %c0_i32, %c0_i32_0 : i32, i32, i32
  }
  func.func @transform_3(%arg0: i32, %arg1: i32, %arg2: i32) -> (i32, i32) {
    %c0_i32 = arith.constant 0 : i32
    %c0_i32_0 = arith.constant 0 : i32
    %c0_i32_1 = arith.constant 0 : i32
    return %c0_i32, %c0_i32_0 : i32, i32
  }
  func.func @transform_4(%arg0: i32, %arg1: i32, %arg2: i32) -> (i32, i32, i32, i32) {
    %c0_i32 = arith.constant 0 : i32
    %c0_i32_0 = arith.constant 0 : i32
    return %arg0, %arg2, %arg1, %c0_i32 : i32, i32, i32, i32
  }
}

</mosaic_0001>

<bundles_post_ra>
// kernel: tpu_custom_call.1
= control target key start
LH: loop header
LB: loop body
LE: loop exit
PB: predicated region body
PF: predicated region fallthrough
CT: control target
= control target key end

     0   :  { %9 = vsyncpa [#allocation3], 0  ;;  %s5348_s0 = inlined_call_operand.vmem [shape: f32[2,256,32], index: 0, kind: input, shape index: {}]   ;;  %s5349_s1 = inlined_call_operand.vmem [shape: f32[3,32,128], index: 1, kind: input, shape index: {}]   ;;  %s5350_s2 = inlined_call_operand.vmem [shape: f32[3,8,128], index: 2, kind: input, shape index: {}]   ;;  %s5351_s3 = inlined_call_operand.vmem [shape: f32[128,128], index: 3, kind: input, shape index: {}]   ;;  %s5352_s4 = inlined_call_operand.hbm [shape: f32[2,3,256,128], index: 4, kind: output, shape index: {}]  }
   0x1   :  { %11 = vsyncpa [#allocation3 + $0x1], 0  ;;  %s3284_s15 = smov 0   ;;  %s3286_s16 = smov 0  }
   0x2   :  { %s3288_s17 = smov 0   ;;  %s3290_s18 = smov 0  }
   0x3   :  { %s3292_s19 = smov 0   ;;  %s3294_s20 = smov 0  }
   0x4   :  { %s3296_s21 = smov 0   ;;  %s3298_s22 = smov 0  }
   0x5 LB: > { %s2405_s23 = sadd.s32 4294967295, %s3253_s22   ;;  %s2406_s24 = sadd.s32 4294967294, %s3253_s22   ;;  %s3253_s22 = sphi %s3298_s22, %s17_s22   ;;  %s3249_s21 = sphi %s3296_s21, %s5524_s21   ;;  %s3245_s20 = sphi %s3294_s20, %s5523_s20   ;;  %s3241_s19 = sphi %s3292_s19, %s5522_s19   ;;  %s3237_s18 = sphi %s3290_s18, %s5521_s18   ;;  %s3233_s17 = sphi %s3288_s17, %s5520_s17   ;;  %s3229_s16 = sphi %s3286_s16, %s5519_s16   ;;  %s3225_s15 = sphi %s3284_s15, %s5518_s15  }
   0x6   : > { %s29_s25 = sadd.s32 1, %s3245_s20  ;;  %s36_s26 = sadd.s32 1, %s3249_s21 }
   0x7   : > { %p30_p0 = scmp.ge.s32.totalorder %s29_s25, 3  ;;  %p158_p1 = scmp.ne.s32.totalorder %s3233_s17, %s3229_s16 }
   0x8   : > { %p159_p2 = scmp.eq.s32.totalorder %s2405_s23, 5  ;;  %p164_p5 = scmp.ne.s32.totalorder %s3229_s16, %s3225_s15 }
   0x9   : > { %s5526_s25 = smov (%p30_p0, %s29_s25), 0  ;;  %s5528_s26 = smov (!%p30_p0, %s36_s26), %s3249_s21 }
   0xa   : > { %s142_s27 = ssub.s32 %s3245_s20, %s5526_s25  ;;  %p3335_p3 = por %p159_p2, %p158_p1 }
   0xb   : > { %p38_p4 = scmp.ge.s32.totalorder %s5528_s26, 2  ;;  %p165_p6 = scmp.eq.s32.totalorder %s2406_s24, 5 }
   0xc   : > { %p2409_p7 = scmp.ge.s32.totalorder %s3253_s22, 1  ;;  %p214_p9 = scmp.lt.s32.totalorder %s3253_s22, 7 }
   0xd   : > { %s5530_s26 = smov (%p38_p4, %s5528_s26), 0  ;;  %p3344_p8 = por %p165_p6, %p164_p5 }
   0xe   : > { %s141_s30 = ssub.s32 %s3249_s21, %s5530_s26  ;;  %s148_s5 = sadd.s32 1, %s3233_s17 }
   0xf   : > { %s143_s6 = sor.u32 %s142_s27, %s141_s30  ;;  %p215_p10 = pnand %p2409_p7, %p214_p9 }
  0x10   : > { %p146_p11 = scmp.eq.s32.totalorder %s143_s6, 0 }
  0x11   : > { %218 = sbr.rel (%p215_p10) target bundleno = 698 (0x2ba), region = 36 }
  0x12   : > { %s3353_s7 = scalar_select %p146_p11, %s3233_s17, %s148_s5  }
  0x18   : > { %p263_p12 = scmp.lt.s32.totalorder %s3237_s18, 2  ;;  %p254_p13 = scmp.lt.s32.totalorder %s3241_s19, 1  ;;  %vm314_vm0 = vcmask 261120   ;;  %v3255_v10 = vmov 0   ;;  %v1399_v43 = vld [vmem:[%s5351_s3] sm:$0xff]  ;;  %v1400_v44 = vld [vmem:[%s5351_s3 + $0x8] sm:$0xff] }
  0x19   : > { %v2715_v45 = vpack.c.bf16 %v1400_v44, %v1399_v43  ;;  %v1401_v46 = vld [vmem:[%s5351_s3 + $0x10] sm:$0xff]  ;;  %v1402_v47 = vld [vmem:[%s5351_s3 + $0x18] sm:$0xff]  ;;  %v1403_v49 = vld [vmem:[%s5351_s3 + $0x20] sm:$0xff]  ;;  %s2763_s6 = smul.u32 96, %s3241_s19  ;;  %s3256_s23 = smov [#allocation2]  }
  0x1a   : > { %s264_s8 = scalar_select %p263_p12, %s3237_s18, 2  ;;  %v2719_v48 = vpack.c.bf16 %v1402_v47, %v1401_v46  ;;  %v1404_v50 = vld [vmem:[%s5351_s3 + $0x28] sm:$0xff]  ;;  %v1405_v52 = vld [vmem:[%s5351_s3 + $0x30] sm:$0xff]  ;;  %v1406_v53 = vld [vmem:[%s5351_s3 + $0x38] sm:$0xff] }
  0x1b   : > { %s255_s9 = scalar_select %p254_p13, %s3241_s19, 1  ;;  %2747 = vmatprep.subr.bf16.mxu1 %v2715_v45  ;;  %v2723_v51 = vpack.c.bf16 %v1404_v50, %v1403_v49  ;;  %v2727_v54 = vpack.c.bf16 %v1406_v53, %v1405_v52  ;;  %v1407_v55 = vld [vmem:[%s5351_s3 + $0x40] sm:$0xff]  ;;  %v1408_v56 = vld [vmem:[%s5351_s3 + $0x48] sm:$0xff]  ;;  %v1409_v58 = vld [vmem:[%s5351_s3 + $0x50] sm:$0xff] }
  0x1c   : > { %s2486_s10 = sshll.u32 %s264_s8, 5  ;;  %s2415_s11 = sshll.u32 %s264_s8, 3  ;;  %2755 = vmatpush3.bf16.msra.mxu1 %v2715_v45  ;;  %v2731_v57 = vpack.c.bf16 %v1408_v56, %v1407_v55  ;;  %v1410_v59 = vld [vmem:[%s5351_s3 + $0x58] sm:$0xff]  ;;  %v1411_v61 = vld [vmem:[%s5351_s3 + $0x60] sm:$0xff]  ;;  %v1412_v62 = vld [vmem:[%s5351_s3 + $0x68] sm:$0xff] }
  0x1d   : > { %s267_s14 = scalar_lea.vmem %s5349_s1, %s2486_s10  ;;  %s3365_s27 = scalar_lea.vmem %s5350_s2, %s2415_s11  ;;  %2748 = vmatprep.subr.bf16.mxu1 %v2719_v48  ;;  %v2735_v60 = vpack.c.bf16 %v1410_v59, %v1409_v58  ;;  %v2739_v63 = vpack.c.bf16 %v1412_v62, %v1411_v61 }
  0x1e   : > { %v306_v0 = vld [vmem:[%s267_s14] sm:$0xff]  ;;  %v307_v1 = vld [vmem:[%s267_s14 + $0x8] sm:$0xff]  ;;  %s2485_s30 = sshll.u32 %s255_s9, 8  ;;  %v308_v3 = vld [vmem:[%s267_s14 + $0x10] sm:$0xff]  ;;  %s3163_s24 = sshll.u32 %s3256_s23, 4  ;;  %s3164_s24 = int_to_ptr.vmem [resolvable:$false] %s3163_s24 }
  0x1f   : > { %v2707_v2 = vpack.c.bf16 %v307_v1, %v306_v0  ;;  %v309_v4 = vld [vmem:[%s267_s14 + $0x18] sm:$0xff]  ;;  %s3370_s8 = scalar_lea.vmem %s5348_s0, %s2485_s30  ;;  %v3373_v5 = vld [vmem:[%s3365_s27] sm:$0xff]  ;;  %v1413_v0 = vld [vmem:[%s5351_s3 + $0x70] sm:$0xff] }
  0x20   : > { %v274_v6 = vld [vmem:[%s3370_s8] sm:$0xff]  ;;  %v1705_v7 = vrot.slane %v3373_v5, 1  ;;  %v2711_v8 = vpack.c.bf16 %v309_v4, %v308_v3  ;;  %v275_v12 = vld [vmem:[%s3370_s8 + $0x8] sm:$0xff]  ;;  %v276_v13 = vld [vmem:[%s3370_s8 + $0x10] sm:$0xff]  ;;  %2756 = vmatpush3.bf16.msra.mxu1 %v2719_v48  ;;  %v310_v3 = vlaneseq  ;;  %vm828_vm2 = vcmp.gt.f32.partialorder %v3373_v5, 0.0 }
  0x21   : > { %2708 = vmatprep.subr.bf16.mxu0 %v2707_v2  ;;  %2579 = vmatprep.mubr.msk.f32.mxu0 %vm314_vm0, %v274_v6  ;;  %v277_v14 = vld [vmem:[%s3370_s8 + $0x18] sm:$0xff]  ;;  %v278_v15 = vld [vmem:[%s3370_s8 + $0x20] sm:$0xff]  ;;  %v279_v16 = vld [vmem:[%s3370_s8 + $0x28] sm:$0xff]  ;;  %v3547_v49 = vsel %vm828_vm2, 1, %v3255_v10 }
  0x22   : > { %2710 = vmatpush3.bf16.msra.mxu0 %v2707_v2  ;;  %v1707_v9 = vadd.f32 %v1705_v7, %v3373_v5  ;;  %v280_v17 = vld [vmem:[%s3370_s8 + $0x30] sm:$0xff]  ;;  %v281_v18 = vld [vmem:[%s3370_s8 + $0x38] sm:$0xff]  ;;  %v282_v19 = vld [vmem:[%s3370_s8 + $0x40] sm:$0xff]  ;;  %2749 = vmatprep.subr.bf16.mxu1 %v2723_v51  ;;  %v3492_v4 = vshrl.u32 %v310_v3, 7  ;;  %5389 = vst [vmem:[#allocation7_spill] sm:$0xff] %v3547_v49 }
  0x23   : > { %2712 = vmatprep.subr.bf16.mxu0 %v2711_v8  ;;  %v283_v20 = vld [vmem:[%s3370_s8 + $0x48] sm:$0xff]  ;;  %v284_v21 = vld [vmem:[%s3370_s8 + $0x50] sm:$0xff]  ;;  %v285_v22 = vld [vmem:[%s3370_s8 + $0x58] sm:$0xff] }
  0x24   : > { %vm1708_vm1 = vcmp.gt.f32.partialorder %v1707_v9, 0.0  ;;  %v286_v23 = vld [vmem:[%s3370_s8 + $0x60] sm:$0xff]  ;;  %v287_v24 = vld [vmem:[%s3370_s8 + $0x68] sm:$0xff]  ;;  %v288_v25 = vld [vmem:[%s3370_s8 + $0x70] sm:$0xff]  ;;  %2757 = vmatpush3.bf16.msra.mxu1 %v2723_v51  ;;  %5388 = vst [vmem:[#allocation6_spill] sm:$0xff] %v3492_v4  ;;  %v933_v6 = vadd.s32 8, %v3492_v4 }
  0x25   : > { %v3380_v11 = vsel %vm1708_vm1, 1, %v3255_v10  ;;  %v289_v26 = vld [vmem:[%s3370_s8 + $0x78] sm:$0xff]  ;;  %v290_v27 = vld [vmem:[%s3370_s8 + $0x80] sm:$0xff]  ;;  %v291_v28 = vld [vmem:[%s3370_s8 + $0x88] sm:$0xff]  ;;  %2750 = vmatprep.subr.bf16.mxu1 %v2727_v54  ;;  %v935_v7 = vadd.s32 24, %v3492_v4  ;;  %v1161_v44 = vsub.s32 1, %v3492_v4 }
  0x26   : > { %5387 = vst [vmem:[#allocation5_spill] sm:$0xff] %v3380_v11  ;;  %2714 = vmatpush3.bf16.msra.mxu0 %v2711_v8  ;;  %v292_v29 = vld [vmem:[%s3370_s8 + $0x90] sm:$0xff]  ;;  %v293_v30 = vld [vmem:[%s3370_s8 + $0x98] sm:$0xff]  ;;  %v294_v31 = vld [vmem:[%s3370_s8 + $0xa0] sm:$0xff]  ;;  %v934_v8 = vadd.s32 16, %v3492_v4  ;;  %v999_v9 = vcvt.s32.f32 %v933_v6  ;;  %v3555_v55 = vadd.s32 80, %v3492_v4 }
  0x27   : > { %v295_v32 = vld [vmem:[%s3370_s8 + $0xa8] sm:$0xff]  ;;  %v296_v33 = vld [vmem:[%s3370_s8 + $0xb0] sm:$0xff]  ;;  %v297_v34 = vld [vmem:[%s3370_s8 + $0xb8] sm:$0xff]  ;;  %2716 = vmatprep.subr.bf16.mxu0 %v2715_v45  ;;  %v3564_v59 = vrot.slane %v3373_v5, %v1161_v44 }
  0x28   : > { %v298_v35 = vld [vmem:[%s3370_s8 + $0xc0] sm:$0xff]  ;;  %v299_v36 = vld [vmem:[%s3370_s8 + $0xc8] sm:$0xff]  ;;  %v300_v37 = vld [vmem:[%s3370_s8 + $0xd0] sm:$0xff]  ;;  %2758 = vmatpush3.bf16.msra.mxu1 %v2727_v54 }
  0x29   : > { %2580 = vmatmul.mubr.msk.f32.vlgmr.msra.gmra.mrb[0].mxu0 %vm314_vm0, %v275_v12  ;;  %v301_v38 = vld [vmem:[%s3370_s8 + $0xd8] sm:$0xff]  ;;  %v302_v39 = vld [vmem:[%s3370_s8 + $0xe0] sm:$0xff]  ;;  %v303_v40 = vld [vmem:[%s3370_s8 + $0xe8] sm:$0xff]  ;;  %2751 = vmatprep.subr.bf16.mxu1 %v2731_v57  ;;  %v998_v12 = vcvt.s32.f32 %v3492_v4 }
  0x2a   : > { %2582 = vmatprep.mubr.msk.f32.mxu0 %vm314_vm0, %v276_v13  ;;  %v304_v41 = vld [vmem:[%s3370_s8 + $0xf0] sm:$0xff]  ;;  %v305_v42 = vld [vmem:[%s3370_s8 + $0xf8] sm:$0xff]  ;;  %2718 = vmatpush3.bf16.msra.mxu0 %v2715_v45  ;;  %v1001_v13 = vcvt.s32.f32 %v935_v7  ;;  %v1008_v7 = vcvt.s32.f32 %v3555_v55  ;;  %v3659_v55 = vadd.s32 152, %v3492_v4  ;;  %s2481_s8 = sshll.u32 %s3237_s18, 5 }
  0x2b   : > { %2720 = vmatprep.subr.bf16.mxu0 %v2719_v48  ;;  %v1414_v1 = vld [vmem:[%s5351_s3 + $0x78] sm:$0xff]  ;;  %s2291_s9 = sadd.s32 %s2763_s6, %s2481_s8 }
  0x2c   : > { %2759 = vmatpush3.bf16.msra.mxu1 %v2731_v57  ;;  %v2743_v2 = vpack.c.bf16 %v1414_v1, %v1413_v0  ;;  %s2482_s18 = sshll.u32 %s2291_s9, 7 }
  0x2d   : > { %2583 = vmatmul.mubr.msk.f32.gmra.mrb[2].mxu0 %vm314_vm0, %v277_v14  ;;  %2752 = vmatprep.subr.bf16.mxu1 %v2735_v60  ;;  %v3499_v14 = vadd.s32 32, %v3492_v4  ;;  %s5289_s12 = scalar_lea.hbm %s5352_s4, %s2482_s18 }
  0x2e   : > { %2585 = vmatprep.mubr.msk.f32.mxu0 %vm314_vm0, %v278_v15  ;;  %2722 = vmatpush3.bf16.msra.mxu0 %v2719_v48  ;;  %v3502_v15 = vadd.s32 40, %v3492_v4 }
  0x2f   : > { %2724 = vmatprep.subr.bf16.mxu0 %v2723_v51 }
  0x30   : > { %2760 = vmatpush3.bf16.msra.mxu1 %v2735_v60 }
  0x31   : > { %2586 = vmatmul.mubr.msk.f32.gmra.mrb[4].mxu0 %vm314_vm0, %v279_v16  ;;  %2753 = vmatprep.subr.bf16.mxu1 %v2739_v63  ;;  %v1000_v16 = vcvt.s32.f32 %v934_v8  ;;  %v3579_v8 = vadd.s32 88, %v3492_v4 }
  0x32   : > { %2588 = vmatprep.mubr.msk.f32.mxu0 %vm314_vm0, %v280_v17  ;;  %2726 = vmatpush3.bf16.msra.mxu0 %v2723_v51  ;;  %v1032_v17 = vmul.f32 0.0625, %v999_v9 }
  0x33   : > { %2728 = vmatprep.subr.bf16.mxu0 %v2727_v54 }
  0x34   : > { %2761 = vmatpush3.bf16.msra.mxu1 %v2739_v63 }
  0x35   : > { %2589 = vmatmul.mubr.msk.f32.gmra.mrb[6].mxu0 %vm314_vm0, %v281_v18  ;;  %2754 = vmatprep.subr.bf16.mxu1 %v2743_v2  ;;  %v3505_v18 = vadd.s32 56, %v3492_v4 }
  0x36   : > { %2591 = vmatprep.mubr.msk.f32.mxu0 %vm314_vm0, %v282_v19  ;;  %2730 = vmatpush3.bf16.msra.mxu0 %v2727_v54  ;;  %v1031_v19 = vmul.f32 0.0625, %v998_v12 }
  0x37   : > { %2732 = vmatprep.subr.bf16.mxu0 %v2731_v57 }
  0x38   : > { %2762 = vmatpush3.bf16.msra.mxu1 %v2743_v2 }
  0x39   : > { %2592 = vmatmul.mubr.msk.f32.gmra.mrb[8].mxu0 %vm314_vm0, %v283_v20  ;;  %v3508_v20 = vadd.s32 48, %v3492_v4 }
  0x3a   : > { %2594 = vmatprep.mubr.msk.f32.mxu0 %vm314_vm0, %v284_v21  ;;  %2734 = vmatpush3.bf16.msra.mxu0 %v2731_v57  ;;  %v3510_v21 = vmul.f32 0.0625, %v1001_v13 }
  0x3b   : > { %2736 = vmatprep.subr.bf16.mxu0 %v2735_v60 }
  0x3d   : > { %2595 = vmatmul.mubr.msk.f32.gmra.mrb[10].mxu0 %vm314_vm0, %v285_v22  ;;  %v1002_v22 = vcvt.s32.f32 %v3499_v14 }
  0x3e   : > { %2597 = vmatprep.mubr.msk.f32.mxu0 %vm314_vm0, %v286_v23  ;;  %2738 = vmatpush3.bf16.msra.mxu0 %v2735_v60  ;;  %v1003_v23 = vcvt.s32.f32 %v3502_v15 }
  0x3f   : > { %2740 = vmatprep.subr.bf16.mxu0 %v2739_v63 }
  0x41   : > { %2598 = vmatmul.mubr.msk.f32.gmra.mrb[12].mxu0 %vm314_vm0, %v287_v24  ;;  %v3514_v24 = vmul.f32 0.0625, %v1000_v16 }
  0x42   : > { %2600 = vmatprep.mubr.msk.f32.mxu0 %vm314_vm0, %v288_v25  ;;  %2742 = vmatpush3.bf16.msra.mxu0 %v2739_v63  ;;  %v1064_v25 = vfloor.f32 %v1032_v17 }
  0x43   : > { %2744 = vmatprep.subr.bf16.mxu0 %v2743_v2 }
  0x45   : > { %2601 = vmatmul.mubr.msk.f32.gmra.mrb[14].mxu0 %vm314_vm0, %v289_v26  ;;  %v1005_v26 = vcvt.s32.f32 %v3505_v18 }
  0x46   : > { %2603 = vmatprep.mubr.msk.f32.mxu0 %vm314_vm0, %v290_v27  ;;  %2746 = vmatpush3.bf16.msra.mxu0 %v2743_v2  ;;  %v1063_v27 = vfloor.f32 %v1031_v19 }
  0x49   : > { %2604 = vmatmul.mubr.msk.f32.gmra.mrb[16].mxu0 %vm314_vm0, %v291_v28  ;;  %v1004_v28 = vcvt.s32.f32 %v3508_v20  ;;  %v3599_v20 = vadd.s32 96, %v3492_v4 }
  0x4a   : > { %2606 = vmatprep.mubr.msk.f32.mxu0 %vm314_vm0, %v292_v29  ;;  %v3519_v29 = vadd.s32 64, %v3492_v4 }
  0x4c   : > { %v1006_v43 = vcvt.s32.f32 %v3519_v29 }
  0x4d   : > { %2607 = vmatmul.mubr.msk.f32.gmra.mrb[18].mxu0 %vm314_vm0, %v293_v30  ;;  %v1066_v30 = vfloor.f32 %v3510_v21  ;;  %v3602_v21 = vadd.s32 104, %v3492_v4 }
  0x4e   : > { %2609 = vmatprep.mubr.msk.f32.mxu0 %vm314_vm0, %v294_v31  ;;  %v3522_v31 = vmul.f32 0.0625, %v1002_v22  ;;  %v3561_v10 = vmul.f32 0.0625, %v1006_v43 }
  0x4f   : > { %v1098_v45 = vmul.f32 16.0, %v1066_v30 }
  0x50   : > { %v1067_v46 = vfloor.f32 %v3522_v31 }
  0x51   : > { %2610 = vmatmul.mubr.msk.f32.gmra.mrb[20].mxu0 %vm314_vm0, %v295_v32  ;;  %v3524_v32 = vmul.f32 0.0625, %v1003_v23  ;;  %v1130_v60 = vsub.f32 %v1001_v13, %v1098_v45  ;;  %v1071_v13 = vfloor.f32 %v3561_v10 }
  0x52   : > { %2612 = vmatprep.mubr.msk.f32.mxu0 %vm314_vm0, %v296_v33  ;;  %v312_v33 = vsub.s32 0, %v3492_v4  ;;  %v1099_v61 = vmul.f32 16.0, %v1067_v46 }
  0x53   : > { %v1068_v47 = vfloor.f32 %v3524_v32  ;;  %v1103_v31 = vmul.f32 16.0, %v1071_v13  ;;  %v3614_v32 = vadd.s32 120, %v3492_v4 }
  0x54   : > { %v3544_v48 = vrot.slane %v3373_v5, %v312_v33 }
  0x55   : > { %2613 = vmatmul.mubr.msk.f32.gmra.mrb[22].mxu0 %vm314_vm0, %v297_v34  ;;  %v832_v34 = vsub.s32 2, %v3492_v4  ;;  %v1100_v62 = vmul.f32 16.0, %v1068_v47  ;;  %v1135_v44 = vsub.f32 %v1006_v43, %v1103_v31  ;;  %v5356_v45 = vcvt.s32.f32 %v3614_v32 }
  0x56   : > { %2615 = vmatprep.mubr.msk.f32.mxu0 %vm314_vm0, %v298_v35  ;;  %v1065_v35 = vfloor.f32 %v3514_v24 }
  0x57   : > { %v3567_v63 = vrot.slane %v3547_v49, %v832_v34  ;;  %v3570_v0 = vrot.slane %v3373_v5, %v832_v34  ;;  %v1132_v17 = vsub.f32 %v1003_v23, %v1100_v62 }
  0x58   : > { %v1097_v50 = vmul.f32 16.0, %v1065_v35 }
  0x59   : > { %2616 = vmatmul.mubr.msk.f32.gmra.mrb[24].mxu0 %vm314_vm0, %v299_v36  ;;  %v3530_v36 = vadd.s32 72, %v3492_v4  ;;  %vm834_vm3 = vcmp.eq.s32.totalorder %v3567_v63, 1 }
  0x5a   : > { %2618 = vmatprep.mubr.msk.f32.mxu0 %vm314_vm0, %v300_v37  ;;  %v1265_v37 = vsub.s32 3, %v3492_v4  ;;  %v1129_v1 = vsub.f32 %v1000_v16, %v1097_v50  ;;  %v1131_v16 = vsub.f32 %v1002_v22, %v1099_v61  ;;  %v1009_v22 = vcvt.s32.f32 %v3579_v8 }
  0x5b   : > { %v1007_v51 = vcvt.s32.f32 %v3530_v36  ;;  %v1010_v36 = vcvt.s32.f32 %v3599_v20  ;;  %v3682_v8 = vadd.s32 160, %v3492_v4  ;;  %v3691_v20 = vadd.s32 184, %v3492_v4 }
  0x5c   : > { %v3551_v52 = vrot.slane %v3373_v5, %v1265_v37  ;;  %v1011_v37 = vcvt.s32.f32 %v3602_v21 }
  0x5d   : > { %2619 = vmatmul.mubr.msk.f32.gmra.mrb[26].mxu0 %vm314_vm0, %v301_v38  ;;  %v1096_v38 = vmul.f32 16.0, %v1064_v25  ;;  %v3572_v2 = vmul.f32 0.0625, %v1007_v51  ;;  %v3664_v10 = vmul.f32 0.0625, %v1010_v36  ;;  %v5400_v11 = vcvt.s32.f32 %v3682_v8 }
  0x5e   : > { %2621 = vmatprep.mubr.msk.f32.mxu0 %vm314_vm0, %v302_v39  ;;  %v3534_v39 = vmul.f32 0.0625, %v1005_v26  ;;  %5390 = vst [vmem:[#allocation8_spill] sm:$0xff] %v3551_v52  ;;  %v3592_v15 = vmul.f32 %v3551_v52, %v1130_v60  ;;  %v3595_v18 = vmul.f32 %v3551_v52, %v1129_v1  ;;  %v3617_v33 = vmul.f32 %v3551_v52, %v1131_v16 }
  0x5f   : > { %v1128_v53 = vsub.f32 %v999_v9, %v1096_v38  ;;  %v1072_v19 = vfloor.f32 %v3572_v2  ;;  %v3620_v34 = vmul.f32 %v3551_v52, %v1132_v17  ;;  %v3666_v60 = vmul.f32 0.0625, %v1011_v37 }
  0x60   : > { %v1070_v54 = vfloor.f32 %v3534_v39  ;;  %v3671_v1 = vadd.s32 168, %v3492_v4  ;;  %v5358_v17 = vcvt.s32.f32 %v3659_v55 }
  0x61   : > { %2622 = vmatmul.mubr.msk.f32.gmra.mrb[28].mxu0 %vm314_vm0, %v303_v40  ;;  %v1333_v40 = vsub.s32 4, %v3492_v4  ;;  %v3575_v3 = vmul.f32 %v3551_v52, %v1128_v53  ;;  %v3656_v53 = vadd.s32 144, %v3492_v4 }
  0x62   : > { %2624 = vmatprep.mubr.msk.f32.mxu0 %vm314_vm0, %v304_v41  ;;  %v1095_v41 = vmul.f32 16.0, %v1063_v27  ;;  %v1102_v6 = vmul.f32 16.0, %v1070_v54 }
  0x63   : > { %v3558_v56 = vrot.slane %v3373_v5, %v1333_v40  ;;  %v3639_v40 = vmul.f32 0.0625, %v1009_v22  ;;  %v5357_v16 = vcvt.s32.f32 %v3656_v53 }
  0x64   : > { %v1127_v57 = vsub.f32 %v998_v12, %v1095_v41  ;;  %v3642_v41 = vadd.s32 136, %v3492_v4 }
  0x65   : > { %2625 = vmatmul.mubr.msk.f32.gmra.mrb[30].mxu0 %vm314_vm0, %v305_v42  ;;  %v3537_v42 = vmul.f32 0.0625, %v1004_v28  ;;  %5391 = vst [vmem:[#allocation9_spill] sm:$0xff] %v3558_v56  ;;  %v3585_v12 = vmul.f32 %v3558_v56, %v1064_v25  ;;  %v3589_v14 = vmul.f32 %v3558_v56, %v1063_v27  ;;  %v3605_v24 = vmul.f32 %v3558_v56, %v1066_v30 }
  0x66   : > { %v3582_v9 = vmul.f32 %v3551_v52, %v1127_v57  ;;  %v1134_v25 = vsub.f32 %v1005_v26, %v1102_v6  ;;  %v3607_v27 = vmul.f32 0.0625, %v1008_v7  ;;  %v3611_v23 = vmul.f32 %v3558_v56, %v1065_v35 }
  0x67   : > { %v1069_v58 = vfloor.f32 %v3537_v42  ;;  %v3623_v26 = vmul.f32 %v3558_v56, %v1068_v47  ;;  %v3626_v30 = vadd.s32 112, %v3492_v4  ;;  %v3629_v35 = vmul.f32 %v3558_v56, %v1067_v46 }
  0x68   : > { %v3636_v38 = vmul.f32 %v3551_v52, %v1134_v25  ;;  %v1073_v39 = vfloor.f32 %v3607_v27  ;;  %v3649_v46 = vadd.s32 128, %v3492_v4  ;;  %v3652_v47 = vmul.f32 %v3558_v56, %v1070_v54 }
  0x69   : > { %v1101_v5 = vmul.f32 16.0, %v1069_v58  ;;  %v5353_v50 = vcvt.s32.f32 %v3626_v30  ;;  %v3662_v57 = vmul.f32 %v3558_v56, %v1069_v58  ;;  %v1074_v54 = vfloor.f32 %v3639_v40 }
  0x6a   : > { %5392 = vst [vmem:[#allocation10_spill] sm:$0xff] %v3652_v47  ;;  %v1105_v61 = vmul.f32 16.0, %v1073_v39  ;;  %v5354_v62 = vcvt.s32.f32 %v3642_v41  ;;  %v3674_v6 = vmul.f32 %v3551_v52, %v1135_v44  ;;  %v3678_v58 = vmul.f32 0.0625, %v5356_v45 }
  0x6b   : > { %v1133_v29 = vsub.f32 %v1004_v28, %v1101_v5  ;;  %v1104_v28 = vmul.f32 16.0, %v1072_v19  ;;  %v3686_v5 = vmul.f32 0.0625, %v5353_v50  ;;  %v3694_v21 = vmul.f32 %v3558_v56, %v1071_v13 }
  0x6c   : > { %5393 = vst [vmem:[#allocation11_spill] sm:$0xff] %v3674_v6  ;;  %v1075_v25 = vfloor.f32 %v3664_v10  ;;  %v1076_v27 = vfloor.f32 %v3666_v60  ;;  %v1137_v31 = vsub.f32 %v1008_v7, %v1105_v61  ;;  %v3703_v40 = vmul.f32 0.0625, %v5354_v62 }
  0x6d   : > { %v3645_v42 = vmul.f32 %v3551_v52, %v1133_v29  ;;  %v1136_v43 = vsub.f32 %v1007_v51, %v1104_v28  ;;  %v5355_v51 = vcvt.s32.f32 %v3649_v46  ;;  %5394 = vst [vmem:[#allocation12_spill] sm:$0xff] %v3694_v21  ;;  %v3699_v29 = vadd.s32 176, %v3492_v4 }
  0x6e   : > { %v1106_v28 = vmul.f32 16.0, %v1074_v54  ;;  %v1078_v13 = vfloor.f32 %v3678_v58  ;;  %v1077_v7 = vfloor.f32 %v3686_v5  ;;  %v3718_v61 = vmul.f32 0.0625, %v5357_v16 }
  0x6f   : > { %v3707_v50 = vmul.f32 %v3551_v52, %v1136_v43  ;;  %v3712_v10 = vmul.f32 0.0625, %v5355_v51  ;;  %v3722_v62 = vmul.f32 0.0625, %v5358_v17  ;;  %v3728_v58 = vmul.f32 %v3558_v56, %v1072_v19 }
  0x70   : > { %v1107_v51 = vmul.f32 16.0, %v1075_v25  ;;  %v1108_v45 = vmul.f32 16.0, %v1076_v27  ;;  %v3732_v5 = vmul.f32 %v3551_v52, %v1137_v31  ;;  %v1138_v16 = vsub.f32 %v1009_v22, %v1106_v28 }
  0x71   : > { %5395 = vst [vmem:[#allocation13_spill] sm:$0xff] %v3707_v50  ;;  %5396 = vst [vmem:[#allocation14_spill] sm:$0xff] %v3728_v58  ;;  %v1080_v44 = vfloor.f32 %v3703_v40  ;;  %v5398_v17 = vcvt.s32.f32 %v3671_v1  ;;  %v3740_v43 = vmul.f32 %v3558_v56, %v1073_v39  ;;  %v1110_v2 = vmul.f32 16.0, %v1078_v13 }
  0x72   : > { %5397 = vst [vmem:[#allocation15_spill] sm:$0xff] %v3732_v5  ;;  %v1079_v19 = vfloor.f32 %v3712_v10  ;;  %v1051_v58 = vmul.f32 0.0625, %v5400_v11  ;;  %v1109_v60 = vmul.f32 16.0, %v1077_v7  ;;  %v1081_v31 = vfloor.f32 %v3718_v61 }
  0x73   : > { %v3737_v49 = vmul.f32 0.0625, %v5398_v17  ;;  %5399 = vst [vmem:[#allocation16_spill] sm:$0xff] %v3740_v43  ;;  %v1082_v22 = vfloor.f32 %v3722_v62  ;;  %v5401_v28 = vcvt.s32.f32 %v3691_v20  ;;  %v1139_v17 = vsub.f32 %v1010_v36, %v1107_v51 }
  0x74   : > { %v1140_v5 = vsub.f32 %v1011_v37, %v1108_v45  ;;  %v5402_v39 = vcvt.s32.f32 %v3699_v29  ;;  %v3754_v50 = vadd.s32 192, %v3492_v4  ;;  %v3757_v10 = vmul.f32 %v3551_v52, %v1138_v16 }
  0x75   : > { %v3749_v40 = vmul.f32 0.0625, %v5401_v28  ;;  %v1112_v11 = vmul.f32 16.0, %v1080_v44  ;;  %v1084_v61 = vfloor.f32 %v3737_v49  ;;  %v3761_v62 = vadd.s32 200, %v3492_v4 }
  0x76   : > { %v1053_v43 = vmul.f32 0.0625, %v5402_v39  ;;  %5403 = vst [vmem:[#allocation17_spill] sm:$0xff] %v3757_v10  ;;  %v3764_v28 = vmul.f32 %v3558_v56, %v1074_v54  ;;  %v5405_v36 = vcvt.s32.f32 %v3614_v32  ;;  %v1111_v45 = vmul.f32 16.0, %v1079_v19 }
  0x77   : > { %v1083_v51 = vfloor.f32 %v1051_v58  ;;  %v5406_v39 = vcvt.s32.f32 %v3626_v30  ;;  %v1113_v6 = vmul.f32 16.0, %v1081_v31  ;;  %v1114_v16 = vmul.f32 16.0, %v1082_v22 }
  0x78   : > { %5404 = vst [vmem:[#allocation18_spill] sm:$0xff] %v3764_v28  ;;  %v1142_v37 = vsub.f32 %v5405_v36, %v1110_v2  ;;  %v1086_v10 = vfloor.f32 %v3749_v40  ;;  %v3772_v49 = vmul.f32 %v3551_v52, %v1139_v17  ;;  %v3775_v47 = vmul.f32 %v3551_v52, %v1140_v5 }
  0x79   : > { %v1141_v21 = vsub.f32 %v5406_v39, %v1109_v60  ;;  %v1085_v54 = vfloor.f32 %v1053_v43  ;;  %v5360_v28 = vcvt.s32.f32 %v3754_v50  ;;  %v3779_v32 = vmul.f32 %v3558_v56, %v1075_v25 }
  0x7a   : > { %v5407_v58 = vcvt.s32.f32 %v3642_v41  ;;  %v1116_v60 = vmul.f32 16.0, %v1084_v61  ;;  %v3785_v40 = vmul.f32 %v3558_v56, %v1076_v27  ;;  %v3788_v17 = vmul.f32 %v3551_v52, %v1142_v37 }
  0x7b   : > { %v5408_v5 = vcvt.s32.f32 %v3649_v46  ;;  %v1115_v36 = vmul.f32 16.0, %v1083_v51  ;;  %v3794_v25 = vmul.f32 %v3551_v52, %v1141_v21  ;;  %v5409_v41 = vcvt.s32.f32 %v3656_v53 }
  0x7c   : > { %v1144_v30 = vsub.f32 %v5407_v58, %v1112_v11  ;;  %v5410_v39 = vcvt.s32.f32 %v3659_v55  ;;  %v1118_v27 = vmul.f32 16.0, %v1086_v10  ;;  %v3801_v2 = vmul.f32 %v3558_v56, %v1077_v7 }
  0x7d   : > { %v1143_v43 = vsub.f32 %v5408_v5, %v1111_v45  ;;  %v1145_v11 = vsub.f32 %v5409_v41, %v1113_v6  ;;  %v3804_v37 = vmul.f32 %v3558_v56, %v1078_v13  ;;  %v1117_v46 = vmul.f32 16.0, %v1085_v54 }
  0x7e   : > { %v1146_v58 = vsub.f32 %v5410_v39, %v1114_v16  ;;  %v1055_v45 = vmul.f32 0.0625, %v5360_v28  ;;  %v3809_v21 = vmul.f32 %v3551_v52, %v1144_v30  ;;  %v5412_v53 = vcvt.s32.f32 %v3671_v1 }
  0x7f   : > { %v5413_v55 = vcvt.s32.f32 %v3761_v62  ;;  %v3816_v5 = vadd.s32 208, %v3492_v4  ;;  %v3819_v7 = vmul.f32 %v3551_v52, %v1143_v43  ;;  %v3822_v13 = vmul.f32 %v3558_v56, %v1080_v44 }
  0x80   : > { %5411 = vst [vmem:[#allocation19_spill] sm:$0xff] %v3809_v21  ;;  %v1148_v6 = vsub.f32 %v5412_v53, %v1116_v60  ;;  %v5415_v41 = vcvt.s32.f32 %v3682_v8  ;;  %v3827_v30 = vadd.s32 216, %v3492_v4  ;;  %v3830_v1 = vmul.f32 %v3558_v56, %v1079_v19 }
  0x81   : > { %v1056_v16 = vmul.f32 0.0625, %v5413_v55  ;;  %5414 = vst [vmem:[#allocation20_spill] sm:$0xff] %v3822_v13  ;;  %v3833_v60 = vmul.f32 %v3551_v52, %v1145_v11  ;;  %v3836_v53 = vmul.f32 %v3551_v52, %v1146_v58  ;;  %v5419_v43 = vcvt.s32.f32 %v3691_v20 }
  0x82   : > { %v1147_v39 = vsub.f32 %v5415_v41, %v1115_v36  ;;  %5416 = vst [vmem:[#allocation21_spill] sm:$0xff] %v3827_v30  ;;  %v3841_v44 = vmul.f32 %v3558_v56, %v1081_v31  ;;  %v3844_v8 = vmul.f32 %v3558_v56, %v1082_v22  ;;  %v5422_v36 = vcvt.s32.f32 %v3699_v29 }
  0x83   : > { %5417 = vst [vmem:[#allocation22_spill] sm:$0xff] %v3833_v60  ;;  %5418 = vst [vmem:[#allocation23_spill] sm:$0xff] %v3836_v53  ;;  %v1150_v55 = vsub.f32 %v5419_v43, %v1118_v27  ;;  %v1087_v19 = vfloor.f32 %v1055_v45  ;;  %v3849_v28 = vmul.f32 %v3558_v56, %v1083_v51  ;;  %v3852_v11 = vmul.f32 %v3551_v52, %v1148_v6 }
  0x84   : > { %5420 = vst [vmem:[#allocation24_spill] sm:$0xff] %v3841_v44  ;;  %5421 = vst [vmem:[#allocation25_spill] sm:$0xff] %v3844_v8  ;;  %v1149_v41 = vsub.f32 %v5422_v36, %v1117_v46  ;;  %v1088_v58 = vfloor.f32 %v1056_v16  ;;  %v3856_v27 = vmul.f32 %v3551_v52, %v1147_v39  ;;  %v3859_v31 = vmul.f32 %v3558_v56, %v1084_v61 }
  0x85   : > { %5423 = vst [vmem:[#allocation26_spill] sm:$0xff] %v3849_v28  ;;  %5424 = vst [vmem:[#allocation27_spill] sm:$0xff] %v3852_v11  ;;  %v3863_v29 = vadd.s32 224, %v3492_v4  ;;  %v3866_v51 = vmul.f32 %v3558_v56, %v1085_v54  ;;  %v3869_v45 = vmul.f32 %v3551_v52, %v1150_v55  ;;  %v3872_v6 = vmul.f32 %v3558_v56, %v1086_v10 }
  0x86   : > { %5425 = vst [vmem:[#allocation28_spill] sm:$0xff] %v3856_v27  ;;  %5426 = vst [vmem:[#allocation29_spill] sm:$0xff] %v3859_v31  ;;  %v3875_v16 = vadd.s32 232, %v3492_v4  ;;  %v3879_v43 = vmul.f32 %v3551_v52, %v1149_v41  ;;  %v1119_v36 = vmul.f32 16.0, %v1087_v19  ;;  %v3882_v22 = vmul.f32 %v3558_v56, %v1087_v19 }
  0x87   : > { %5427 = vst [vmem:[#allocation30_spill] sm:$0xff] %v3863_v29  ;;  %5428 = vst [vmem:[#allocation31_spill] sm:$0xff] %v3866_v51  ;;  %v1120_v55 = vmul.f32 16.0, %v1088_v58  ;;  %v3886_v20 = vmul.f32 %v3558_v56, %v1088_v58  ;;  %v5435_v10 = vcvt.s32.f32 %v3816_v5  ;;  %v5437_v41 = vcvt.s32.f32 %v3827_v30 }
  0x88   : > { %5429 = vst [vmem:[#allocation32_spill] sm:$0xff] %v3869_v45  ;;  %5430 = vst [vmem:[#allocation33_spill] sm:$0xff] %v3872_v6  ;;  %v3909_v11 = vadd.s32 248, %v3492_v4 }
  0x89   : > { %5431 = vst [vmem:[#allocation34_spill] sm:$0xff] %v3875_v16  ;;  %5432 = vst [vmem:[#allocation35_spill] sm:$0xff] %v3879_v43  ;;  %v3890_v6 = vmul.f32 0.0625, %v5435_v10  ;;  %v3896_v45 = vmul.f32 0.0625, %v5437_v41 }
  0x8a   : > { %5433 = vst [vmem:[#allocation36_spill] sm:$0xff] %v3882_v22  ;;  %5434 = vst [vmem:[#allocation37_spill] sm:$0xff] %v3886_v20  ;;  %v5364_v20 = vcvt.s32.f32 %v3875_v16 }
  0x8b   : > { %5436 = vst [vmem:[#allocation38_spill] sm:$0xff] %v3890_v6  ;;  %5438 = vst [vmem:[#allocation39_spill] sm:$0xff] %v3896_v45 }
  0x8c   : > { %5441 = vst [vmem:[#allocation40_spill] sm:$0xff] %v3909_v11 }
  0xfc   : > { %v2581_v46 = vpop.f32.mrb[0].mxu0 }
  0xfd   : > { %v483_v61 = vadd.f32 %v2581_v46, %v3544_v48  ;;  %v477_v39 = vpop.f32.mrb[1].mxu0 }
  0xfe   : > { %v478_v54 = vadd.f32 %v477_v39, %v3544_v48 }
  0xff   : > { %v2449_v51 = vmul.f32 -1.442695, %v483_v61  ;;  %v836_v46 = vsel %vm834_vm3, %v483_v61, 0.0  ;;  %v5439_v61 = vcvt.s32.f32 %v3754_v50 }
 0x100   : > { %v869_v22 = vmul.f32 1.442695, %v836_v46  ;;  %v2448_v39 = vmul.f32 -1.442695, %v478_v54  ;;  %v835_v58 = vsel %vm834_vm3, %v478_v54, 0.0  ;;  %v2584_v56 = vpop.f32.mrb[2].mxu0  ;;  %v5440_v46 = vcvt.s32.f32 %v3761_v62 }
 0x101   : > { %2838 = vpow2.f32 %v2449_v51  ;;  %v867_v10 = vmul.f32 1.442695, %v835_v58  ;;  %v493_v31 = vadd.f32 %v2584_v56, %v3544_v48  ;;  %v487_v43 = vpop.f32.mrb[3].mxu0  ;;  %v1151_v30 = vsub.f32 %v5439_v61, %v1119_v36 }
 0x102   : > { %2840 = vpow2.f32 %v869_v22  ;;  %v488_v41 = vadd.f32 %v487_v43, %v3544_v48  ;;  %v1152_v19 = vsub.f32 %v5440_v46, %v1120_v55  ;;  %v5372_v56 = vfloor.f32 %v3890_v6 }
 0x103   : > { %2842 = vpow2.f32 %v2448_v39  ;;  %v2451_v54 = vmul.f32 -1.442695, %v493_v31  ;;  %v838_v51 = vsel %vm834_vm3, %v493_v31, 0.0  ;;  %v5442_v31 = vcvt.s32.f32 %v3863_v29 }
 0x104   : > { %2844 = vpow2.f32 %v867_v10  ;;  %v873_v58 = vmul.f32 1.442695, %v838_v51  ;;  %v2450_v50 = vmul.f32 -1.442695, %v488_v41  ;;  %v837_v22 = vsel %vm834_vm3, %v488_v41, 0.0  ;;  %v2587_v43 = vpop.f32.mrb[4].mxu0 }
 0x105   : > { %2846 = vpow2.f32 %v2451_v54  ;;  %v871_v62 = vmul.f32 1.442695, %v837_v22  ;;  %v503_v36 = vadd.f32 %v2587_v43, %v3544_v48  ;;  %v497_v55 = vpop.f32.mrb[5].mxu0  ;;  %v3921_v46 = vmul.f32 0.0625, %v5442_v31 }
 0x106   : > { %2848 = vpow2.f32 %v873_v58  ;;  %v498_v61 = vadd.f32 %v497_v55, %v3544_v48  ;;  %v3925_v10 = vmul.f32 0.0625, %v5364_v20  ;;  %v3930_v51 = vmul.f32 %v3551_v52, %v1151_v30 }
 0x107   : > { %5443 = vst [vmem:[#allocation41_spill] sm:$0xff] %v3921_v46  ;;  %2850 = vpow2.f32 %v2450_v50  ;;  %v2453_v41 = vmul.f32 -1.442695, %v503_v36  ;;  %v840_v54 = vsel %vm834_vm3, %v503_v36, 0.0  ;;  %v3936_v50 = vmul.f32 %v3551_v52, %v1152_v19 }
 0x108   : > { %5444 = vst [vmem:[#allocation42_spill] sm:$0xff] %v3925_v10  ;;  %5445 = vst [vmem:[#allocation43_spill] sm:$0xff] %v3930_v51  ;;  %2852 = vpow2.f32 %v871_v62  ;;  %v877_v58 = vmul.f32 1.442695, %v840_v54  ;;  %v2452_v22 = vmul.f32 -1.442695, %v498_v61 }
 0x109   : > { %v839_v43 = vsel %vm834_vm3, %v498_v61, 0.0  ;;  %v2590_v55 = vpop.f32.mrb[6].mxu0  ;;  %2854 = vpow2.f32 %v2453_v41  ;;  %5446 = vst [vmem:[#allocation44_spill] sm:$0xff] %v3936_v50  ;;  %v3940_v30 = vadd.s32 240, %v3492_v4 }
 0x10a   : > { %v875_v31 = vmul.f32 1.442695, %v839_v43  ;;  %v513_v20 = vadd.f32 %v2590_v55, %v3544_v48  ;;  %v507_v39 = vpop.f32.mrb[7].mxu0  ;;  %2856 = vpow2.f32 %v877_v58  ;;  %v1121_v43 = vmul.f32 16.0, %v5372_v56 }
 0x10b   : > { %v508_v36 = vadd.f32 %v507_v39, %v3544_v48  ;;  %5447 = vst [vmem:[#allocation45_spill] sm:$0xff] %v3940_v30  ;;  %v2839_v54 = vpop.eup %2838  ;;  %2858 = vpow2.f32 %v2452_v22  ;;  %v5448_v39 = vfloor.f32 %v3896_v45  ;;  %v5452_v45 = vcvt.s32.f32 %v3816_v5 }
 0x10c   : > { %v2455_v61 = vmul.f32 -1.442695, %v513_v20  ;;  %v842_v41 = vsel %vm834_vm3, %v513_v20, 0.0  ;;  %v2841_v55 = vpop.eup %2840  ;;  %v733_v19 = vadd.f32 1.0, %v2839_v54  ;;  %2860 = vpow2.f32 %v875_v31  ;;  %v2593_v29 = vpop.f32.mrb[8].mxu0 }
 0x10d   : > { %v881_v58 = vmul.f32 1.442695, %v842_v41  ;;  %v3949_v4 = vmul.f32 16.0, %v5448_v39  ;;  %v2843_v16 = vpop.eup %2842  ;;  %v2454_v62 = vmul.f32 -1.442695, %v508_v36  ;;  %v841_v22 = vsel %vm834_vm3, %v508_v36, 0.0 }
 0x10e   : > { %2862 = vpow2.f32 %v2455_v61  ;;  %v523_v20 = vadd.f32 %v2593_v29, %v3544_v48  ;;  %v517_v52 = vpop.f32.mrb[9].mxu0  ;;  %v2845_v6 = vpop.eup %2844  ;;  %v732_v56 = vadd.f32 1.0, %v2843_v16  ;;  %v879_v39 = vmul.f32 1.442695, %v841_v22 }
 0x10f   : > { %5449 = vst [vmem:[#allocation46_spill] sm:$0xff] %v3949_v4  ;;  %2864 = vrcp.f32 %v733_v19  ;;  %v518_v31 = vadd.f32 %v517_v52, %v3544_v48  ;;  %v2847_v41 = vpop.eup %2846  ;;  %v5450_v16 = vcvt.s32.f32 %v3909_v11  ;;  %v3967_v61 = vsub.f32 %v5452_v45, %v1121_v43 }
 0x110   : > { %2866 = vpow2.f32 %v881_v58  ;;  %v2849_v51 = vpop.eup %2848  ;;  %v735_v36 = vadd.f32 1.0, %v2847_v41  ;;  %v844_v29 = vsel %vm834_vm3, %v523_v20, 0.0  ;;  %v2596_v50 = vpop.f32.mrb[10].mxu0  ;;  %v2457_v54 = vmul.f32 -1.442695, %v523_v20 }
 0x111   : > { %2868 = vrcp.f32 %v732_v56  ;;  %v3962_v19 = vmul.f32 0.0625, %v5450_v16  ;;  %v2851_v52 = vpop.eup %2850  ;;  %v533_v58 = vadd.f32 %v2596_v50, %v3544_v48  ;;  %v527_v22 = vpop.f32.mrb[11].mxu0  ;;  %5453 = vst [vmem:[#allocation48_spill] sm:$0xff] %v3967_v61  ;;  %v843_v30 = vsel %vm834_vm3, %v518_v31, 0.0 }
 0x112   : > { %2870 = vpow2.f32 %v2454_v62  ;;  %v2853_v56 = vpop.eup %2852  ;;  %v734_v41 = vadd.f32 1.0, %v2851_v52  ;;  %v528_v11 = vadd.f32 %v527_v22, %v3544_v48  ;;  %v885_v62 = vmul.f32 1.442695, %v844_v29 }
 0x113   : > { %5451 = vst [vmem:[#allocation47_spill] sm:$0xff] %v3962_v19  ;;  %2872 = vrcp.f32 %v735_v36  ;;  %v2855_v16 = vpop.eup %2854  ;;  %v3973_v19 = vmul.f32 %v2841_v55, %v3570_v0  ;;  %v1199_v50 = vmul.f32 %v2845_v6, %v3570_v0  ;;  %v2456_v45 = vmul.f32 -1.442695, %v518_v31 }
 0x114   : > { %2874 = vpow2.f32 %v879_v39  ;;  %v2857_v20 = vpop.eup %2856  ;;  %v737_v5 = vadd.f32 1.0, %v2855_v16  ;;  %v846_v43 = vsel %vm834_vm3, %v533_v58, 0.0  ;;  %v2599_v36 = vpop.f32.mrb[12].mxu0  ;;  %v883_v61 = vmul.f32 1.442695, %v843_v30 }
 0x115   : > { %2876 = vrcp.f32 %v734_v41  ;;  %v2859_v52 = vpop.eup %2858  ;;  %v543_v22 = vadd.f32 %v2599_v36, %v3544_v48  ;;  %v537_v10 = vpop.f32.mrb[13].mxu0  ;;  %v3980_v55 = vmul.f32 %v2849_v51, %v3570_v0  ;;  %v2459_v29 = vmul.f32 -1.442695, %v533_v58 }
 0x116   : > { %2878 = vpow2.f32 %v2457_v54  ;;  %v2861_v39 = vpop.eup %2860  ;;  %v736_v6 = vadd.f32 1.0, %v2859_v52  ;;  %v845_v31 = vsel %vm834_vm3, %v528_v11, 0.0  ;;  %v889_v16 = vmul.f32 1.442695, %v846_v43 }
 0x117   : > { %2880 = vrcp.f32 %v737_v5  ;;  %v538_v46 = vadd.f32 %v537_v10, %v3544_v48  ;;  %v3986_v30 = vmul.f32 %v2853_v56, %v3570_v0  ;;  %v2458_v51 = vmul.f32 -1.442695, %v528_v11 }
 0x118   : > { %v2863_v41 = vpop.eup %2862  ;;  %2882 = vpow2.f32 %v885_v62  ;;  %v848_v5 = vsel %vm834_vm3, %v543_v22, 0.0  ;;  %v2602_v52 = vpop.f32.mrb[14].mxu0  ;;  %v887_v4 = vmul.f32 1.442695, %v845_v31  ;;  %v3992_v43 = vmul.f32 %v2857_v20, %v3570_v0 }
 0x119   : > { %v2865_v54 = vpop.eup %2864  ;;  %2884 = vrcp.f32 %v736_v6  ;;  %v739_v36 = vadd.f32 1.0, %v2863_v41  ;;  %v553_v28 = vadd.f32 %v2602_v52, %v3544_v48  ;;  %v547_v62 = vpop.f32.mrb[15].mxu0  ;;  %v2461_v6 = vmul.f32 -1.442695, %v543_v22 }
 0x11a   : > { %v2867_v58 = vpop.eup %2866  ;;  %2886 = vpow2.f32 %v2456_v45  ;;  %v1164_v56 = vmul.f32 %v2865_v54, %v3564_v59  ;;  %v3996_v11 = vmul.f32 %v2861_v39, %v3570_v0  ;;  %v893_v8 = vmul.f32 1.442695, %v848_v5 }
 0x11b   : > { %v2869_v10 = vpop.eup %2868  ;;  %2888 = vrcp.f32 %v739_v36  ;;  %v847_v45 = vsel %vm834_vm3, %v538_v46, 0.0  ;;  %v850_v54 = vsel %vm834_vm3, %v553_v28, 0.0  ;;  %v548_v22 = vadd.f32 %v547_v62, %v3544_v48 }
 0x11c   : > { %v2871_v41 = vpop.eup %2870  ;;  %2890 = vpow2.f32 %v883_v61  ;;  %v1163_v31 = vmul.f32 %v2869_v10, %v3564_v59  ;;  %v2605_v36 = vpop.f32.mrb[16].mxu0  ;;  %v2460_v61 = vmul.f32 -1.442695, %v538_v46  ;;  %v891_v10 = vmul.f32 1.442695, %v847_v45 }
 0x11d   : > { %v4001_v52 = vpop.eup %2872  ;;  %v738_v20 = vadd.f32 1.0, %v2871_v41  ;;  %2892 = vpow2.f32 %v2459_v29  ;;  %v563_v5 = vadd.f32 %v2605_v36, %v3544_v48  ;;  %v557_v27 = vpop.f32.mrb[17].mxu0  ;;  %v1232_v41 = vadd.f32 %v3973_v19, %v1164_v56 }
 0x11e   : > { %v4006_v39 = vpop.eup %2874  ;;  %2894 = vpow2.f32 %v889_v16  ;;  %v1231_v53 = vadd.f32 %v1199_v50, %v1163_v31  ;;  %v4011_v29 = vmul.f32 %v2867_v58, %v3570_v0  ;;  %v2463_v62 = vmul.f32 -1.442695, %v553_v28 }
 0x11f   : > { %v2877_v44 = vpop.eup %2876  ;;  %2896 = vrcp.f32 %v738_v20  ;;  %v897_v60 = vmul.f32 1.442695, %v850_v54  ;;  %v849_v50 = vsel %vm834_vm3, %v548_v22, 0.0  ;;  %v558_v45 = vadd.f32 %v557_v27, %v3544_v48 }
 0x120   : > { %v2879_v13 = vpop.eup %2878  ;;  %2898 = vpow2.f32 %v2458_v51  ;;  %v1299_v21 = vadd.f32 %v3582_v9, %v1231_v53  ;;  %v2608_v31 = vpop.f32.mrb[18].mxu0  ;;  %v852_v51 = vsel %vm834_vm3, %v563_v5, 0.0  ;;  %v1300_v27 = vadd.f32 %v3575_v3, %v1232_v41 }
 0x121   : > { %v4014_v16 = vpop.eup %2880  ;;  %v741_v46 = vadd.f32 1.0, %v2879_v13  ;;  %2900 = vpow2.f32 %v887_v4  ;;  %v573_v28 = vadd.f32 %v2608_v31, %v3544_v48  ;;  %v567_v58 = vpop.f32.mrb[19].mxu0  ;;  %v2462_v4 = vmul.f32 -1.442695, %v548_v22 }
 0x122   : > { %v4019_v19 = vpop.eup %2882  ;;  %2902 = vpow2.f32 %v2461_v6  ;;  %v4025_v9 = vadd.f32 %v3589_v14, %v1299_v21  ;;  %v568_v53 = vadd.f32 %v567_v58, %v3544_v48  ;;  %v895_v20 = vmul.f32 1.442695, %v849_v50 }
 0x123   : > { %v2885_v13 = vpop.eup %2884  ;;  %2904 = vrcp.f32 %v741_v46  ;;  %v2465_v6 = vmul.f32 -1.442695, %v563_v5  ;;  %v1165_v54 = vmul.f32 %v2877_v44, %v3564_v59  ;;  %v901_v14 = vmul.f32 1.442695, %v852_v51 }
 0x124   : > { %5454 = vst [vmem:[#allocation49_spill] sm:$0xff] %v4025_v9  ;;  %v2887_v56 = vpop.eup %2886  ;;  %2906 = vpow2.f32 %v893_v8  ;;  %2659 = vmatprep.mubr.f32.mxu0 %v4025_v9  ;;  %v851_v21 = vsel %vm834_vm3, %v558_v45, 0.0  ;;  %v2611_v22 = vpop.f32.mrb[20].mxu0  ;;  %v2464_v3 = vmul.f32 -1.442695, %v558_v45  ;;  %v854_v8 = vsel %vm834_vm3, %v573_v28, 0.0 }
 0x125   : > { %v4031_v36 = vpop.eup %2888  ;;  %v740_v31 = vadd.f32 1.0, %v2887_v56  ;;  %2908 = vpow2.f32 %v2460_v61  ;;  %v4040_v5 = vadd.f32 %v3585_v12, %v1300_v27  ;;  %v577_v44 = vpop.f32.mrb[21].mxu0  ;;  %v853_v61 = vsel %vm834_vm3, %v568_v53, 0.0 }
 0x126   : > { %v4035_v46 = vpop.eup %2890  ;;  %2910 = vpow2.f32 %v891_v10  ;;  %v583_v50 = vadd.f32 %v2611_v22, %v3544_v48  ;;  %v1233_v51 = vadd.f32 %v3986_v30, %v1165_v54  ;;  %v4048_v45 = vmul.f32 1.442695, %v851_v21 }
 0x127   : > { %5455 = vst [vmem:[#allocation50_spill] sm:$0xff] %v4040_v5  ;;  %v2893_v41 = vpop.eup %2892  ;;  %2912 = vrcp.f32 %v740_v31  ;;  %v4050_v56 = vmul.f32 -1.442695, %v573_v28  ;;  %2660 = vmatmul.mubr.f32.vlgmr.msra.gmra.mrb[32].mxu0 %v4040_v5  ;;  %v4053_v27 = vmul.f32 1.442695, %v854_v8  ;;  %v578_v22 = vadd.f32 %v577_v44, %v3544_v48 }
 0x128   : > { %v4046_v58 = vpop.eup %2894  ;;  %v743_v10 = vadd.f32 1.0, %v2893_v41  ;;  %2914 = vpow2.f32 %v2463_v62  ;;  %v4055_v31 = vmul.f32 -1.442695, %v568_v53  ;;  %v2614_v9 = vpop.f32.mrb[22].mxu0  ;;  %v4058_v54 = vmul.f32 1.442695, %v853_v61 }
 0x129   : > { %v2897_v12 = vpop.eup %2896  ;;  %2916 = vpow2.f32 %v897_v60  ;;  %v1301_v62 = vadd.f32 %v3595_v18, %v1233_v51  ;;  %v1166_v28 = vmul.f32 %v4001_v52, %v3564_v59  ;;  %v587_v21 = vpop.f32.mrb[23].mxu0  ;;  %v4065_v8 = vmul.f32 -1.442695, %v583_v50 }
 0x12a   : > { %v2899_v30 = vpop.eup %2898  ;;  %2918 = vrcp.f32 %v743_v10  ;;  %v856_v53 = vsel %vm834_vm3, %v583_v50, 0.0  ;;  %v1167_v51 = vmul.f32 %v2885_v13, %v3564_v59 }
 0x12b   : > { %v4063_v41 = vpop.eup %2900  ;;  %v742_v60 = vadd.f32 1.0, %v2899_v30  ;;  %2920 = vpow2.f32 %v2462_v4  ;;  %v4070_v61 = vadd.f32 %v3611_v23, %v1301_v62  ;;  %v1234_v18 = vadd.f32 %v3980_v55, %v1166_v28 }
 0x12c   : > { %v2903_v44 = vpop.eup %2902  ;;  %2922 = vpow2.f32 %v895_v20  ;;  %v855_v4 = vsel %vm834_vm3, %v578_v22, 0.0  ;;  %v593_v30 = vadd.f32 %v2614_v9, %v3544_v48  ;;  %v2617_v5 = vpop.f32.mrb[24].mxu0  ;;  %v4081_v20 = vmul.f32 1.442695, %v856_v53 }
 0x12d   : > { %v4074_v52 = vpop.eup %2904  ;;  %2924 = vrcp.f32 %v742_v60  ;;  %v745_v10 = vadd.f32 1.0, %v2903_v44  ;;  %2662 = vmatprep.mubr.f32.mxu0 %v4070_v61  ;;  %v1302_v23 = vadd.f32 %v3592_v15, %v1234_v18  ;;  %v588_v55 = vadd.f32 %v587_v21, %v3544_v48  ;;  %v597_v13 = vpop.f32.mrb[25].mxu0 }
 0x12e   : > { %v4079_v50 = vpop.eup %2906  ;;  %2926 = vpow2.f32 %v2465_v6  ;;  %v4086_v28 = vmul.f32 -1.442695, %v578_v22  ;;  %v1235_v60 = vadd.f32 %v3996_v11, %v1167_v51  ;;  %v1168_v9 = vmul.f32 %v4014_v16, %v3564_v59 }
 0x12f   : > { %v2909_v62 = vpop.eup %2908  ;;  %2928 = vrcp.f32 %v745_v10  ;;  %v4093_v53 = vmul.f32 1.442695, %v855_v4  ;;  %v4096_v15 = vadd.f32 %v3605_v24, %v1302_v23  ;;  %v858_v22 = vsel %vm834_vm3, %v593_v30, 0.0 }
 0x130   : > { %v4091_v44 = vpop.eup %2910  ;;  %v744_v6 = vadd.f32 1.0, %v2909_v62  ;;  %2930 = vpow2.f32 %v901_v14  ;;  %v1303_v18 = vadd.f32 %v3617_v33, %v1235_v60  ;;  %v1236_v11 = vadd.f32 %v3992_v43, %v1168_v9  ;;  %v2620_v51 = vpop.f32.mrb[26].mxu0 }
 0x131   : > { %v2913_v21 = vpop.eup %2912  ;;  %2932 = vpow2.f32 %v2464_v3  ;;  %2663 = vmatmul.mubr.f32.gmra.mrb[34].mxu0 %v4096_v15  ;;  %v857_v14 = vsel %vm834_vm3, %v588_v55, 0.0  ;;  %v603_v24 = vadd.f32 %v2617_v5, %v3544_v48  ;;  %v1169_v10 = vmul.f32 %v2897_v12, %v3564_v59  ;;  %v607_v3 = vpop.f32.mrb[27].mxu0 }
 0x132   : > { %v2915_v16 = vpop.eup %2914  ;;  %2934 = vrcp.f32 %v744_v6  ;;  %v4110_v33 = vadd.f32 %v3629_v35, %v1303_v18  ;;  %v1304_v43 = vadd.f32 %v3620_v34, %v1236_v11  ;;  %v598_v62 = vadd.f32 %v597_v13, %v3544_v48 }
 0x133   : > { %v4107_v4 = vpop.eup %2916  ;;  %v747_v23 = vadd.f32 1.0, %v2915_v16  ;;  %2936 = vpow2.f32 %v4050_v56  ;;  %v4117_v9 = vmul.f32 -1.442695, %v593_v30  ;;  %v4119_v5 = vmul.f32 1.442695, %v858_v22 }
 0x134   : > { %5456 = vst [vmem:[#allocation51_spill] sm:$0xff] %v4110_v33  ;;  %v4114_v60 = vpop.eup %2918  ;;  %v1205_v12 = vmul.f32 %v4006_v39, %v3570_v0  ;;  %2938 = vpow2.f32 %v4048_v45  ;;  %v4124_v35 = vmul.f32 -1.442695, %v588_v55  ;;  %v4126_v18 = vmul.f32 1.442695, %v857_v14  ;;  %2665 = vmatprep.mubr.f32.mxu0 %v4110_v33  ;;  %v2623_v56 = vpop.f32.mrb[28].mxu0 }
 0x135   : > { %v2921_v6 = vpop.eup %2920  ;;  %v4130_v34 = vadd.f32 %v3623_v26, %v1304_v43  ;;  %2940 = vrcp.f32 %v747_v23  ;;  %v4134_v22 = vmul.f32 -1.442695, %v603_v24  ;;  %v617_v11 = vpop.f32.mrb[29].mxu0  ;;  %v860_v45 = vsel %vm834_vm3, %v603_v24, 0.0 }
 0x136   : > { %v4132_v30 = vpop.eup %2922  ;;  %v746_v13 = vadd.f32 1.0, %v2921_v6  ;;  %v1237_v39 = vadd.f32 %v1205_v12, %v1169_v10  ;;  %2942 = vpow2.f32 %v4055_v31  ;;  %v859_v26 = vsel %vm834_vm3, %v598_v62, 0.0 }
 0x137   : > { %v2925_v16 = vpop.eup %2924  ;;  %2666 = vmatmul.mubr.f32.gmra.mrb[36].mxu0 %v4130_v34  ;;  %v1170_v55 = vmul.f32 %v4031_v36, %v3564_v59  ;;  %2944 = vpow2.f32 %v4053_v27  ;;  %v613_v23 = vadd.f32 %v2620_v51, %v3544_v48  ;;  %v1171_v31 = vmul.f32 %v2913_v21, %v3564_v59 }
 0x138   : > { %v2927_v14 = vpop.eup %2926  ;;  %v1305_v10 = vadd.f32 %v3645_v42, %v1237_v39  ;;  %2946 = vrcp.f32 %v746_v13  ;;  %v4150_v24 = vmul.f32 -1.442695, %v598_v62  ;;  %v4153_v33 = vpop.f32.mrb[30].mxu0  ;;  %v608_v27 = vadd.f32 %v607_v3, %v3544_v48 }
 0x139   : > { %v4148_v43 = vpop.eup %2928  ;;  %v749_v12 = vadd.f32 1.0, %v2927_v14  ;;  %v1238_v6 = vadd.f32 %v4011_v29, %v1170_v55  ;;  %2948 = vpow2.f32 %v4065_v8  ;;  %v1207_v21 = vmul.f32 %v4035_v46, %v3570_v0  ;;  %v4164_v51 = vpop.f32.mrb[31].mxu0  ;;  %v5457_v46 = vld [vmem:[#allocation10_spill] sm:$0xff] }
 0x13a   : > { %v4155_v36 = vpop.eup %2930  ;;  %v4159_v42 = vadd.f32 %v3662_v57, %v1305_v10  ;;  %2950 = vpow2.f32 %v4058_v54  ;;  %v4167_v29 = vmul.f32 1.442695, %v860_v45  ;;  %v4169_v13 = vmul.f32 1.442695, %v859_v26 }
 0x13b   : > { %v2933_v62 = vpop.eup %2932  ;;  %v1306_v39 = vadd.f32 %v3636_v38, %v1238_v6  ;;  %2952 = vrcp.f32 %v749_v12  ;;  %v4173_v3 = vmul.f32 -1.442695, %v613_v23  ;;  %v1239_v55 = vadd.f32 %v1207_v21, %v1171_v31  ;;  %v5458_v31 = vld [vmem:[#allocation11_spill] sm:$0xff] }
 0x13c   : > { %v2935_v8 = vpop.eup %2934  ;;  %v748_v57 = vadd.f32 1.0, %v2933_v62  ;;  %2668 = vmatprep.mubr.f32.mxu1 %v4159_v42  ;;  %2954 = vpow2.f32 %v4086_v28  ;;  %v1172_v54 = vmul.f32 %v4074_v52, %v3564_v59  ;;  %v1208_v45 = vmul.f32 %v4019_v19, %v3570_v0 }
 0x13d   : > { %v4177_v14 = vadd.f32 %v5457_v46, %v1306_v39  ;;  %v2937_v38 = vpop.eup %2936  ;;  %2956 = vpow2.f32 %v4081_v20  ;;  %v862_v26 = vsel %vm834_vm3, %v613_v23, 0.0  ;;  %v861_v10 = vsel %vm834_vm3, %v608_v27, 0.0  ;;  %v5459_v20 = vld [vmem:[#allocation12_spill] sm:$0xff] }
 0x13e   : > { %v1307_v28 = vadd.f32 %v5458_v31, %v1239_v55  ;;  %v4189_v12 = vpop.eup %2938  ;;  %2958 = vrcp.f32 %v748_v57  ;;  %v751_v6 = vadd.f32 1.0, %v2937_v38  ;;  %v1240_v52 = vadd.f32 %v1208_v45, %v1172_v54  ;;  %v5461_v54 = vld [vmem:[#allocation13_spill] sm:$0xff] }
 0x13f   : > { %2669 = vmatmul.mubr.f32.vlgmr.msra.gmra.mrb[0].mxu1 %v4177_v14  ;;  %v623_v19 = vadd.f32 %v2623_v56, %v3544_v48  ;;  %v4193_v21 = vpop.eup %2940  ;;  %2960 = vpow2.f32 %v4117_v9  ;;  %v618_v62 = vadd.f32 %v617_v11, %v3544_v48  ;;  %v1173_v39 = vmul.f32 %v2925_v16, %v3564_v59 }
 0x140   : > { %v4197_v23 = vadd.f32 %v5459_v20, %v1307_v28  ;;  %v2943_v55 = vpop.eup %2942  ;;  %2962 = vpow2.f32 %v4093_v53  ;;  %v4202_v57 = vmul.f32 1.442695, %v862_v26  ;;  %v4204_v46 = vmul.f32 -1.442695, %v608_v27  ;;  %v5462_v53 = vld [vmem:[#allocation14_spill] sm:$0xff] }
 0x141   : > { %v1308_v56 = vadd.f32 %v5461_v54, %v1240_v52  ;;  %v4207_v45 = vpop.eup %2944  ;;  %2964 = vrcp.f32 %v751_v6  ;;  %v750_v9 = vadd.f32 1.0, %v2943_v55  ;;  %v4209_v38 = vmul.f32 1.442695, %v861_v10 }
 0x142   : > { %5460 = vst [vmem:[#allocation10_spill] sm:$0xff] %v4197_v23  ;;  %2671 = vmatprep.mubr.f32.mxu1 %v4197_v23  ;;  %v1209_v11 = vmul.f32 %v4063_v41, %v3570_v0  ;;  %v2947_v16 = vpop.eup %2946  ;;  %2966 = vpow2.f32 %v4124_v35  ;;  %v864_v27 = vsel %vm834_vm3, %v623_v19, 0.0  ;;  %v1174_v31 = vmul.f32 %v4114_v60, %v3564_v59 }
 0x143   : > { %v4216_v26 = vadd.f32 %v5462_v53, %v1308_v56  ;;  %v2949_v28 = vpop.eup %2948  ;;  %2968 = vpow2.f32 %v4119_v5  ;;  %v863_v10 = vsel %vm834_vm3, %v618_v62, 0.0  ;;  %v1210_v41 = vmul.f32 %v4046_v58, %v3570_v0 }
 0x144   : > { %v1241_v6 = vadd.f32 %v1209_v11, %v1173_v39  ;;  %v4227_v35 = vpop.eup %2950  ;;  %2970 = vrcp.f32 %v750_v9  ;;  %v753_v52 = vadd.f32 1.0, %v2949_v28  ;;  %v4230_v20 = vmul.f32 -1.442695, %v623_v19  ;;  %v5463_v39 = vld [vmem:[#allocation15_spill] sm:$0xff]  ;;  %v5464_v28 = vld [vmem:[#allocation16_spill] sm:$0xff] }
 0x145   : > { %2672 = vmatmul.mubr.f32.gmra.mrb[2].mxu1 %v4216_v26  ;;  %v633_v60 = vadd.f32 %v4153_v33, %v3544_v48  ;;  %v2953_v55 = vpop.eup %2952  ;;  %2972 = vpow2.f32 %v4134_v22  ;;  %v4235_v5 = vmul.f32 1.442695, %v864_v27  ;;  %v1242_v56 = vadd.f32 %v1210_v41, %v1174_v31  ;;  %v5465_v27 = vld [vmem:[#allocation17_spill] sm:$0xff] }
 0x146   : > { %v1309_v54 = vadd.f32 %v5463_v39, %v1241_v6  ;;  %v2955_v58 = vpop.eup %2954  ;;  %2974 = vpow2.f32 %v4126_v18  ;;  %v4239_v9 = vmul.f32 -1.442695, %v618_v62  ;;  %v4241_v11 = vmul.f32 1.442695, %v863_v10  ;;  %v5466_v10 = vld [vmem:[#allocation18_spill] sm:$0xff] }
 0x147   : > { %v1175_v19 = vmul.f32 %v2935_v8, %v3564_v59  ;;  %v4244_v53 = vpop.eup %2956  ;;  %2976 = vrcp.f32 %v753_v52  ;;  %v752_v33 = vadd.f32 1.0, %v2955_v58  ;;  %v1310_v23 = vadd.f32 %v5465_v27, %v1242_v56 }
 0x148   : > { %v4247_v22 = vadd.f32 %v5464_v28, %v1309_v54  ;;  %v2959_v6 = vpop.eup %2958  ;;  %2978 = vpow2.f32 %v4150_v24  ;;  %v4251_v31 = vmul.f32 -1.442695, %v633_v60  ;;  %v4255_v18 = vadd.f32 %v4164_v51, %v3544_v48 }
 0x149   : > { %v1211_v8 = vmul.f32 %v4091_v44, %v3570_v0  ;;  %v2961_v62 = vpop.eup %2960  ;;  %2980 = vrcp.f32 %v752_v33  ;;  %v4261_v41 = vadd.f32 %v5466_v10, %v1310_v23  ;;  %v1176_v52 = vmul.f32 %v4148_v43, %v3564_v59 }
 0x14a   : > { %2674 = vmatprep.mubr.f32.mxu1 %v4247_v22  ;;  %v1212_v24 = vmul.f32 %v4079_v50, %v3570_v0  ;;  %v4267_v39 = vpop.eup %2962  ;;  %v755_v48 = vadd.f32 1.0, %v2961_v62  ;;  %v4271_v51 = vsel %vm834_vm3, %v633_v60, 0.0  ;;  %v1177_v54 = vmul.f32 %v2947_v16, %v3564_v59 }
 0x14b   : > { %v1243_v44 = vadd.f32 %v1211_v8, %v1175_v19  ;;  %v2965_v56 = vpop.eup %2964  ;;  %2982 = vpow2.f32 %v4173_v3  ;;  %2675 = vmatmul.mubr.f32.gmra.mrb[4].mxu1 %v4261_v41  ;;  %v1213_v43 = vmul.f32 %v4132_v30, %v3570_v0  ;;  %v1178_v50 = vmul.f32 %v4193_v21, %v3564_v59 }
 0x14c   : > { %v1244_v23 = vadd.f32 %v1212_v24, %v1176_v52  ;;  %v2967_v58 = vpop.eup %2966  ;;  %2984 = vpow2.f32 %v4167_v29  ;;  %v1214_v16 = vmul.f32 %v4107_v4, %v3570_v0  ;;  %v1179_v19 = vmul.f32 %v2959_v6, %v3564_v59 }
 0x14d   : > { %v1311_v60 = vadd.f32 %v3772_v49, %v1243_v44  ;;  %v4285_v3 = vpop.eup %2968  ;;  %2986 = vrcp.f32 %v755_v48  ;;  %v754_v33 = vadd.f32 1.0, %v2967_v58  ;;  %v1245_v30 = vadd.f32 %v1213_v43, %v1177_v54  ;;  %v5467_v43 = vld [vmem:[#allocation19_spill] sm:$0xff] }
 0x14e   : > { %v1312_v28 = vadd.f32 %v3775_v47, %v1244_v23  ;;  %v2971_v27 = vpop.eup %2970  ;;  %2988 = vpow2.f32 %v4204_v46  ;;  %v1246_v29 = vadd.f32 %v1214_v16, %v1178_v50  ;;  %v1215_v49 = vmul.f32 %v4189_v12, %v3570_v0 }
 0x14f   : > { %v4290_v21 = vadd.f32 %v3779_v32, %v1311_v60  ;;  %v2973_v4 = vpop.eup %2972  ;;  %2990 = vrcp.f32 %v754_v33  ;;  %v1313_v8 = vadd.f32 %v3794_v25, %v1245_v30  ;;  %v1180_v47 = vmul.f32 %v2953_v55, %v3564_v59 }
 0x150   : > { %v4295_v6 = vadd.f32 %v3785_v40, %v1312_v28  ;;  %v2975_v62 = vpop.eup %2974  ;;  %v757_v10 = vadd.f32 1.0, %v2973_v4  ;;  %2992 = vpow2.f32 %v4169_v13  ;;  %v1314_v32 = vadd.f32 %v3788_v17, %v1246_v29 }
 0x151   : > { %2677 = vmatprep.mubr.f32.mxu1 %v4290_v21  ;;  %v1247_v46 = vadd.f32 %v1215_v49, %v1179_v19  ;;  %v2977_v52 = vpop.eup %2976  ;;  %2994 = vpow2.f32 %v4230_v20  ;;  %v4305_v40 = vadd.f32 %v3801_v2, %v1313_v8  ;;  %v1216_v25 = vmul.f32 %v4155_v36, %v3570_v0  ;;  %v5469_v19 = vld [vmem:[#allocation20_spill] sm:$0xff] }
 0x152   : > { %2678 = vmatmul.mubr.f32.gmra.mrb[6].mxu1 %v4295_v6  ;;  %v1181_v12 = vmul.f32 %v2971_v27, %v3564_v59  ;;  %v2979_v55 = vpop.eup %2978  ;;  %2996 = vrcp.f32 %v757_v10  ;;  %v2478_v13 = vmul.f32 -1.442695, %v4255_v18  ;;  %v1217_v24 = vmul.f32 %v4227_v35, %v3570_v0 }
 0x153   : > { %v1315_v17 = vadd.f32 %v3819_v7, %v1247_v46  ;;  %v2981_v20 = vpop.eup %2980  ;;  %v756_v48 = vadd.f32 1.0, %v2979_v55  ;;  %2680 = vmatprep.mubr.f32.mxu1 %v4305_v40  ;;  %v4316_v2 = vadd.f32 %v3804_v37, %v1314_v32  ;;  %v1248_v44 = vadd.f32 %v1216_v25, %v1180_v47 }
 0x154   : > { %v1182_v36 = vmul.f32 %v2965_v56, %v3564_v59  ;;  %2998 = vpow2.f32 %v4239_v9  ;;  %v1249_v23 = vadd.f32 %v1217_v24, %v1181_v12  ;;  %v1218_v7 = vmul.f32 %v4207_v45, %v3570_v0 }
 0x155   : > { %v4321_v54 = vadd.f32 %v3830_v1, %v1315_v17  ;;  %v2983_v35 = vpop.eup %2982  ;;  %3000 = vrcp.f32 %v756_v48  ;;  %v1316_v50 = vadd.f32 %v5467_v43, %v1248_v44  ;;  %v1183_v37 = vmul.f32 %v2981_v20, %v3564_v59  ;;  %v5468_v1 = vld [vmem:[#allocation22_spill] sm:$0xff]  ;;  %v5475_v48 = vld [vmem:[#allocation27_spill] sm:$0xff] }
 0x156   : > { %2681 = vmatmul.mubr.f32.gmra.mrb[8].mxu1 %v4316_v2  ;;  %v1219_v56 = vmul.f32 %v4267_v39, %v3570_v0  ;;  %v2985_v58 = vpop.eup %2984  ;;  %v759_v9 = vadd.f32 1.0, %v2983_v35  ;;  %3002 = vpow2.f32 %v4202_v57  ;;  %v1317_v60 = vadd.f32 %v5468_v1, %v1249_v23  ;;  %v5470_v39 = vld [vmem:[#allocation24_spill] sm:$0xff]  ;;  %v5471_v57 = vld [vmem:[#allocation23_spill] sm:$0xff]  ;;  %v5474_v17 = vld [vmem:[#allocation26_spill] sm:$0xff] }
 0x157   : > { %2683 = vmatprep.mubr.f32.mxu1 %v4321_v54  ;;  %v1250_v45 = vadd.f32 %v1218_v7, %v1182_v36  ;;  %v2987_v16 = vpop.eup %2986  ;;  %3004 = vpow2.f32 %v4251_v31  ;;  %v4335_v33 = vadd.f32 %v5469_v19, %v1316_v50  ;;  %v1184_v30 = vmul.f32 %v2977_v52, %v3564_v59  ;;  %v5472_v31 = vld [vmem:[#allocation28_spill] sm:$0xff]  ;;  %v5473_v52 = vld [vmem:[#allocation25_spill] sm:$0xff]  ;;  %v5476_v50 = vld [vmem:[#allocation35_spill] sm:$0xff] }
 0x158   : > { %v1251_v28 = vadd.f32 %v1219_v56, %v1183_v37  ;;  %v2989_v27 = vpop.eup %2988  ;;  %3006 = vrcp.f32 %v759_v9  ;;  %v4339_v29 = vadd.f32 %v5470_v39, %v1317_v60  ;;  %v1220_v4 = vmul.f32 %v4244_v53, %v3570_v0  ;;  %v5477_v9 = vld [vmem:[#allocation29_spill] sm:$0xff]  ;;  %v5478_v60 = vld [vmem:[#allocation32_spill] sm:$0xff]  ;;  %v5479_v19 = vld [vmem:[#allocation31_spill] sm:$0xff] }
 0x159   : > { %v1318_v49 = vadd.f32 %v5471_v57, %v1250_v45  ;;  %v2991_v8 = vpop.eup %2990  ;;  %v758_v47 = vadd.f32 1.0, %v2989_v27  ;;  %3008 = vpow2.f32 %v4209_v38  ;;  %v1221_v32 = vmul.f32 %v2975_v62, %v3570_v0 }
 0x15a   : > { %2684 = vmatmul.mubr.f32.gmra.mrb[10].mxu1 %v4335_v33  ;;  %v1319_v10 = vadd.f32 %v5472_v31, %v1251_v28  ;;  %v2993_v46 = vpop.eup %2992  ;;  %3010 = vpow2.f32 %v2478_v13  ;;  %v1252_v12 = vadd.f32 %v1220_v4, %v1184_v30  ;;  %v1185_v53 = vmul.f32 %v2991_v8, %v3564_v59  ;;  %v5481_v30 = vld [vmem:[#allocation21_spill] sm:$0xff]  ;;  %v5485_v31 = vld [vmem:[#allocation42_spill] sm:$0xff] }
 0x15b   : > { %2686 = vmatprep.mubr.f32.mxu1 %v4339_v29  ;;  %v4350_v25 = vadd.f32 %v5473_v52, %v1318_v49  ;;  %v2995_v55 = vpop.eup %2994  ;;  %3012 = vrcp.f32 %v758_v47  ;;  %v1186_v24 = vmul.f32 %v2987_v16, %v3564_v59  ;;  %v1222_v62 = vmul.f32 %v4285_v3, %v3570_v0  ;;  %v5483_v4 = vld [vmem:[#allocation41_spill] sm:$0xff] }
 0x15c   : > { %v4354_v38 = vadd.f32 %v5474_v17, %v1319_v10  ;;  %v2997_v20 = vpop.eup %2996  ;;  %v761_v13 = vadd.f32 1.0, %v2995_v55  ;;  %3014 = vpow2.f32 %v4235_v5  ;;  %v1320_v44 = vadd.f32 %v5475_v48, %v1252_v12 }
 0x15d   : > { %v1253_v36 = vadd.f32 %v1221_v32, %v1185_v53  ;;  %3016 = vpow2.f32 %v4241_v11  ;;  %v1254_v23 = vadd.f32 %v1222_v62, %v1186_v24  ;;  %v1188_v7 = vmul.f32 %v2997_v20, %v3564_v59  ;;  %v5487_v53 = vld [vmem:[#allocation45_spill] sm:$0xff] }
 0x15e   : > { %2687 = vmatmul.mubr.f32.gmra.mrb[12].mxu1 %v4350_v25  ;;  %v1224_v35 = vmul.f32 %v2985_v58, %v3570_v0  ;;  %v2999_v43 = vpop.eup %2998  ;;  %3018 = vrcp.f32 %v761_v13  ;;  %v929_v3 = vmul.f32 1.442695, %v4271_v51  ;;  %v865_v5 = vsel %vm834_vm3, %v4255_v18, 0.0  ;;  %v5480_v18 = vld [vmem:[#allocation46_spill] sm:$0xff]  ;;  %v5489_v62 = vld [vmem:[#allocation33_spill] sm:$0xff]  ;;  %v5490_v13 = vld [vmem:[#allocation44_spill] sm:$0xff] }
 0x15f   : > { %2689 = vmatprep.mubr.f32.mxu1 %v4354_v38  ;;  %v1321_v37 = vadd.f32 %v5476_v50, %v1253_v36  ;;  %v3001_v11 = vpop.eup %3000  ;;  %v760_v56 = vadd.f32 1.0, %v2999_v43  ;;  %v4372_v1 = vadd.f32 %v5477_v9, %v1320_v44  ;;  %v1322_v45 = vadd.f32 %v5478_v60, %v1254_v23  ;;  %v5492_v43 = vld [vmem:[#allocation48_spill] sm:$0xff]  ;;  %v5494_v9 = vld [vmem:[#allocation47_spill] sm:$0xff] }
 0x160   : > { %v1256_v58 = vadd.f32 %v1224_v35, %v1188_v7  ;;  %v3003_v16 = vpop.eup %3002  ;;  %v1187_v51 = vmul.f32 %v3001_v11, %v3564_v59  ;;  %v1223_v63 = vmul.f32 %v2993_v46, %v3570_v0  ;;  %v5482_v27 = vcvt.s32.f32 %v5481_v30  ;;  %v5491_v7 = vld [vmem:[#allocation43_spill] sm:$0xff]  ;;  %v5496_v30 = vld [vmem:[#allocation37_spill] sm:$0xff] }
 0x161   : > { %v4376_v28 = vadd.f32 %v5479_v19, %v1321_v37  ;;  %v3005_v57 = vpop.eup %3004  ;;  %3020 = vrcp.f32 %v760_v56  ;;  %v927_v49 = vmul.f32 1.442695, %v865_v5  ;;  %v5484_v8 = vfloor.f32 %v5483_v4 }
 0x162   : > { %v1154_v39 = vsub.f32 %v5482_v27, %v5480_v18  ;;  %2690 = vmatmul.mubr.f32.gmra.mrb[14].mxu1 %v4372_v1  ;;  %v5486_v10 = vfloor.f32 %v5485_v31  ;;  %v3007_v52 = vpop.eup %3006  ;;  %v763_v12 = vadd.f32 1.0, %v3005_v57  ;;  %3022 = vpow2.f32 %v929_v3  ;;  %v5493_v3 = vld [vmem:[#allocation8_spill] sm:$0xff] }
 0x163   : > { %v1123_v47 = vmul.f32 16.0, %v5484_v8  ;;  %2692 = vmatprep.mubr.f32.mxu1 %v4376_v28  ;;  %v1255_v46 = vadd.f32 %v1223_v63, %v1187_v51  ;;  %v5488_v55 = vcvt.s32.f32 %v5487_v53  ;;  %v3009_v24 = vpop.eup %3008  ;;  %v4394_v20 = vadd.f32 %v5489_v62, %v1322_v45  ;;  %v5502_v62 = vld [vmem:[#allocation39_spill] sm:$0xff] }
 0x164   : > { %v1124_v32 = vmul.f32 16.0, %v5486_v10  ;;  %v1324_v48 = vadd.f32 %v5490_v13, %v1256_v58  ;;  %v1190_v44 = vmul.f32 %v3007_v52, %v3564_v59  ;;  %v1226_v36 = vmul.f32 %v3003_v16, %v3570_v0  ;;  %v3011_v23 = vpop.eup %3010  ;;  %v5495_v58 = vld [vmem:[#allocation36_spill] sm:$0xff]  ;;  %v5499_v52 = vld [vmem:[#allocation38_spill] sm:$0xff] }
 0x165   : > { %v4391_v17 = vmul.f32 0.0625, %v5488_v55  ;;  %3024 = vrcp.f32 %v763_v12  ;;  %v1323_v35 = vadd.f32 %v5491_v7, %v1255_v46  ;;  %v1293_v5 = vmul.f32 %v5493_v3, %v5492_v43  ;;  %v3013_v37 = vpop.eup %3012  ;;  %v5501_v46 = vld [vmem:[#allocation9_spill] sm:$0xff]  ;;  %v5504_v13 = vld [vmem:[#allocation30_spill] sm:$0xff] }
 0x166   : > { %v1294_v50 = vmul.f32 %v5493_v3, %v1154_v39  ;;  %v762_v11 = vadd.f32 1.0, %v3011_v23  ;;  %3026 = vpow2.f32 %v927_v49  ;;  %2693 = vmatmul.mubr.f32.gmra.mrb[16].mxu1 %v4394_v20  ;;  %v1258_v56 = vadd.f32 %v1226_v36, %v1190_v44  ;;  %v3015_v45 = vpop.eup %3014  ;;  %v5497_v39 = vld [vmem:[#allocation34_spill] sm:$0xff] }
 0x167   : > { %v1094_v60 = vfloor.f32 %v5494_v9  ;;  %v4406_v16 = vadd.f32 %v5495_v58, %v1323_v35  ;;  %v1189_v19 = vmul.f32 %v3013_v37, %v3564_v59  ;;  %v1225_v51 = vmul.f32 %v3009_v24, %v3570_v0  ;;  %v3017_v18 = vpop.eup %3016 }
 0x168   : > { %v1093_v63 = vfloor.f32 %v4391_v17  ;;  %3028 = vrcp.f32 %v762_v11  ;;  %v4412_v27 = vadd.f32 %v5496_v30, %v1324_v48  ;;  %v5498_v57 = vcvt.s32.f32 %v5497_v39  ;;  %v3019_v8 = vpop.eup %3018  ;;  %v5506_v30 = vld [vmem:[#allocation40_spill] sm:$0xff] }
 0x169   : > { %2695 = vmatprep.mubr.f32.mxu1 %v4406_v16  ;;  %v1257_v10 = vadd.f32 %v1225_v51, %v1189_v19  ;;  %v5500_v12 = vfloor.f32 %v5499_v52  ;;  %v5503_v24 = vfloor.f32 %v5502_v62  ;;  %v5505_v44 = vcvt.s32.f32 %v5504_v13 }
 0x16a   : > { %v1156_v49 = vsub.f32 %v5498_v57, %v1124_v32  ;;  %2696 = vmatmul.mubr.f32.gmra.mrb[18].mxu1 %v4412_v27  ;;  %v1326_v48 = vadd.f32 %v1294_v50, %v1258_v56  ;;  %v1192_v32 = vmul.f32 %v3019_v8, %v3564_v59  ;;  %v1228_v23 = vmul.f32 %v3015_v45, %v3570_v0 }
 0x16b   : > { %v1361_v55 = vmul.f32 %v5501_v46, %v5500_v12  ;;  %v1362_v17 = vmul.f32 %v5501_v46, %v5503_v24  ;;  %v1155_v36 = vsub.f32 %v5505_v44, %v1123_v47  ;;  %v1126_v7 = vmul.f32 16.0, %v1094_v60  ;;  %v3021_v37 = vpop.eup %3020 }
 0x16c   : > { %v1325_v35 = vadd.f32 %v1293_v5, %v1257_v10  ;;  %v1125_v43 = vmul.f32 16.0, %v1093_v63  ;;  %v1260_v11 = vadd.f32 %v1228_v23, %v1192_v32  ;;  %v1296_v9 = vmul.f32 %v5493_v3, %v1156_v49  ;;  %v3023_v58 = vpop.eup %3022 }
 0x16d   : > { %v1191_v51 = vmul.f32 %v3021_v37, %v3564_v59  ;;  %v1227_v47 = vmul.f32 %v3017_v18, %v3570_v0  ;;  %v1295_v50 = vmul.f32 %v5493_v3, %v1155_v36  ;;  %v4434_v56 = vadd.f32 %v1362_v17, %v1326_v48 }
 0x16e   : > { %v4429_v19 = vadd.f32 %v1361_v55, %v1325_v35  ;;  %v5507_v45 = vcvt.s32.f32 %v5506_v30  ;;  %v5508_v49 = vfloor.f32 %v5483_v4  ;;  %v5509_v10 = vcvt.s32.f32 %v5487_v53 }
 0x16f   : > { %v3025_v5 = vpop.eup %3024  ;;  %v1259_v57 = vadd.f32 %v1227_v47, %v1191_v51  ;;  %v1328_v18 = vadd.f32 %v1296_v9, %v1260_v11  ;;  %v5510_v55 = vfloor.f32 %v5485_v31  ;;  %v1230_v17 = vmul.f32 %v3023_v58, %v3570_v0  ;;  %v5512_v58 = vld [vmem:[#allocation5_spill] sm:$0xff] }
 0x170   : > { %v1158_v39 = vsub.f32 %v5507_v45, %v1126_v7  ;;  %2698 = vmatprep.mubr.f32.mxu1 %v4429_v19  ;;  %v1363_v8 = vmul.f32 %v5501_v46, %v5508_v49  ;;  %v1157_v52 = vsub.f32 %v5509_v10, %v1125_v43  ;;  %v3027_v12 = vpop.eup %3026  ;;  %v1194_v24 = vmul.f32 %v3025_v5, %v3564_v59  ;;  %v5514_v45 = vld [vmem:[#allocation49_spill] sm:$0xff] }
 0x171   : > { %2699 = vmatmul.mubr.f32.gmra.mrb[20].mxu1 %v4434_v56  ;;  %v1364_v62 = vmul.f32 %v5501_v46, %v5510_v55  ;;  %v1327_v13 = vadd.f32 %v1295_v50, %v1259_v57  ;;  %v1229_v32 = vmul.f32 %v3027_v12, %v3570_v0  ;;  %v1365_v35 = vmul.f32 %v5501_v46, %v1093_v63  ;;  %v5511_v0 = vld [vmem:[#allocation6_spill] sm:$0xff]  ;;  %v5515_v55 = vld [vmem:[#allocation7_spill] sm:$0xff] }
 0x172   : > { %v3029_v44 = vpop.eup %3028  ;;  %v1262_v4 = vadd.f32 %v1230_v17, %v1194_v24  ;;  %v1298_v36 = vmul.f32 %v5493_v3, %v1158_v39  ;;  %v1297_v23 = vmul.f32 %v5493_v3, %v1157_v52  ;;  %v1366_v37 = vmul.f32 %v5501_v46, %v1094_v60  ;;  %v5513_v46 = vld [vmem:[#allocation50_spill] sm:$0xff] }
 0x173   : > { %v4451_v48 = vadd.f32 %v1363_v8, %v1327_v13  ;;  %v1193_v53 = vmul.f32 %v3029_v44, %v3564_v59  ;;  %v4456_v31 = vadd.f32 %v1364_v62, %v1328_v18  ;;  %v1712_v3 = vsub.s32 6, %v5511_v0 }
 0x174   : > { %v1330_v43 = vadd.f32 %v1298_v36, %v1262_v4  ;;  %v2009_v49 = vsub.s32 7, %v5511_v0  ;;  %v2178_v36 = vsub.s32 5, %v5511_v0 }
 0x175   : > { %2701 = vmatprep.mubr.f32.mxu1 %v4451_v48  ;;  %v1261_v7 = vadd.f32 %v1229_v32, %v1193_v53  ;;  %v4470_v51 = vrot.slane %v5512_v58, %v1712_v3 }
 0x176   : > { %2702 = vmatmul.mubr.f32.gmra.mrb[22].mxu1 %v4456_v31  ;;  %v4464_v59 = vadd.f32 %v1366_v37, %v1330_v43  ;;  %v4487_v62 = vrot.slane %v5515_v55, %v2009_v49 }
 0x177   : > { %v1329_v11 = vadd.f32 %v1297_v23, %v1261_v7  ;;  %vm1714_vm4 = vcmp.eq.s32.totalorder %v4470_v51, 1 }
 0x178   : > { %vm2011_vm5 = vcmp.eq.s32.totalorder %v4487_v62, 1 }
 0x179   : > { %v4462_v9 = vadd.f32 %v1365_v35, %v1329_v11 }
 0x17b   : > { %2704 = vmatprep.mubr.f32.mxu1 %v4462_v9 }
 0x17c   : > { %2705 = vmatmul.mubr.f32.gmra.mrb[24].mxu1 %v4464_v59 }
 0x1fa   : > { %v2661_v63 = vpop.f32.mrb[32].mxu0 }
 0x1fb   : > { %v1641_v47 = vsub.f32 1.0, %v2661_v63  ;;  %v1481_v50 = vpop.f32.mrb[33].mxu0 }
 0x1fc   : > { %v1640_v60 = vsub.f32 1.0, %v1481_v50 }
 0x1fd   : > { %v1673_v30 = vmul.f32 %v1641_v47, %v5513_v46 }
 0x1fe   : > { %v4475_v39 = vmul.f32 %v1640_v60, %v5514_v45 }
 0x1ff   : > { %v1716_v5 = vsel %vm1714_vm4, %v1673_v30, 0.0 }
 0x200   : > { %3030 = vrsqrt.f32 %v1716_v5  ;;  %v1715_v57 = vsel %vm1714_vm4, %v4475_v39, 0.0  ;;  %vm1756_vm6 = vcmp.eq.f32.partialorder %v1716_v5, inf  ;;  %vm1758_vm7 = vcmp.eq.f32.partialorder %v1716_v5, 0.0 }
 0x201   : > { %3032 = vrsqrt.f32 %v1715_v57  ;;  %vm1749_vm8 = vcmp.eq.f32.partialorder %v1715_v57, inf  ;;  %v1752_v11 = vand.u32 2147483648, %v1715_v57  ;;  %vm1751_vm9 = vcmp.eq.f32.partialorder %v1715_v57, 0.0 }
 0x204   : > { %v2664_v8 = vpop.f32.mrb[34].mxu0 }
 0x205   : > { %v1643_v10 = vsub.f32 1.0, %v2664_v8  ;;  %v1491_v52 = vpop.f32.mrb[35].mxu0 }
 0x206   : > { %v1642_v12 = vsub.f32 1.0, %v1491_v52 }
 0x207   : > { %v4484_v18 = vmul.f32 %v1643_v10, %v4096_v15  ;;  %v5516_v10 = vld [vmem:[#allocation51_spill] sm:$0xff] }
 0x208   : > { %v4490_v24 = vmul.f32 %v1642_v12, %v4070_v61  ;;  %v1759_v61 = vand.u32 2147483648, %v1716_v5 }
 0x209   : > { %v1718_v17 = vsel %vm1714_vm4, %v4484_v18, 0.0 }
 0x20a   : > { %v2667_v13 = vpop.f32.mrb[36].mxu0  ;;  %v3031_v44 = vpop.eup %3030  ;;  %3034 = vrsqrt.f32 %v1718_v17  ;;  %v4499_v15 = vsel %vm1714_vm4, %v4490_v24, 0.0  ;;  %vm1770_vm10 = vcmp.eq.f32.partialorder %v1718_v17, inf  ;;  %vm1772_vm11 = vcmp.eq.f32.partialorder %v1718_v17, 0.0 }
 0x20b   : > { %v1501_v4 = vpop.f32.mrb[37].mxu0  ;;  %v1755_v53 = vmul.f32 %v3031_v44, %v1716_v5  ;;  %v1645_v32 = vsub.f32 1.0, %v2667_v13  ;;  %v3033_v23 = vpop.eup %3032  ;;  %3036 = vrsqrt.f32 %v4499_v15  ;;  %vm1763_vm12 = vcmp.eq.f32.partialorder %v4499_v15, inf }
 0x20c   : > { %v1748_v35 = vmul.f32 %v3033_v23, %v1715_v57  ;;  %v1644_v0 = vsub.f32 1.0, %v1501_v4  ;;  %vm1765_vm13 = vcmp.eq.f32.partialorder %v4499_v15, 0.0 }
 0x20d   : > { %v1757_v7 = vsel %vm1756_vm6, %v1716_v5, %v1755_v53  ;;  %v4504_v43 = vmul.f32 %v1645_v32, %v4130_v34  ;;  %v3158_v34 = vld [vmem:[%s3365_s27] sm:$0xff]  ;;  %s250_s27 = sand.u32 1, %s3229_s16  }
 0x20e   : > { %v1760_v37 = vsel %vm1758_vm7, %v1759_v61, %v1757_v7  ;;  %v1750_v63 = vsel %vm1749_vm8, %v1715_v57, %v1748_v35  ;;  %v4515_v46 = vrot.slane %v3158_v34, %v2178_v36  ;;  %v4520_v57 = vmul.f32 %v1644_v0, %v5516_v10  ;;  %s2410_s30 = sshll.u32 %s250_s27, 8  ;;  %s5296_s13 = scalar_lea.sflag [#allocation3], %s250_s27 }
 0x20f   : > { %v2013_v58 = vsel %vm2011_vm5, %v1760_v37, 0.0  ;;  %v4511_v47 = vsel %vm1714_vm4, %v4504_v43, 0.0  ;;  %v1753_v60 = vsel %vm1751_vm9, %v1752_v11, %v1750_v63  ;;  %v4522_v44 = vrot.slane %v3158_v34, %v1712_v3  ;;  %s4607_s5 = scalar_lea.vmem [#allocation2], %s2410_s30  ;;  %s3165_s30 = scalar_lea.vmem %s3164_s24, 8192 }
 0x210   : > { %v2046_v50 = vmul.f32 1.442695, %v2013_v58  ;;  %3038 = vrsqrt.f32 %v4511_v47  ;;  %v2012_v45 = vsel %vm2011_vm5, %v1753_v60, 0.0  ;;  %v4527_v4 = vsel %vm1714_vm4, %v4520_v57, 0.0  ;;  %s2294_s19 = sshll.u32 %s4607_s5, 4  ;;  %s5291_s19 = int_to_ptr.vmem [resolvable:$true] %s2294_s19 }
 0x211   : > { %v2044_v8 = vmul.f32 1.442695, %v2012_v45  ;;  %v4529_v36 = vrot.slane %v3158_v34, %v2009_v49  ;;  %v2181_v53 = vmul.f32 %v4515_v46, %v1673_v30  ;;  %v1773_v61 = vand.u32 2147483648, %v1718_v17  ;;  %s3159_s14 = scalar_lea.vmem %s5291_s19, 4096  ;;  %p3166_p4 = scmp.lt.s32.totalorder %s5291_s19, %s3164_s24 }
 0x212   : > { %v2670_v5 = vpop.f32.mrb[0].mxu1  ;;  %3040 = vpow2.f32 %v2046_v50  ;;  %v2180_v35 = vmul.f32 %v4515_v46, %v4475_v39  ;;  %v1766_v58 = vand.u32 2147483648, %v4499_v15  ;;  %v4559_v34 = vmul.f32 %v4515_v46, %v4484_v18  ;;  %p3160_p0 = scmp.ne.s32.totalorder %s5291_s19, %s3159_s14  ;;  %p3167_p5 = scmp.lt.s32.totalorder %s3165_s30, %s3159_s14 }
 0x213   : > { %v1511_v52 = vpop.f32.mrb[1].mxu1  ;;  %v1647_v12 = vsub.f32 1.0, %v2670_v5  ;;  %3042 = vpow2.f32 %v2044_v8  ;;  %v1976_v8 = vmul.f32 %v4522_v44, %v1760_v37  ;;  %v4571_v10 = vmul.f32 %v4515_v46, %v4490_v24 }
 0x214   : > { %v1646_v55 = vsub.f32 1.0, %v1511_v52  ;;  %v3035_v13 = vpop.eup %3034  ;;  %3044 = vrsqrt.f32 %v4527_v4  ;;  %vm1784_vm14 = vcmp.eq.f32.partialorder %v4511_v47, inf  ;;  %vm1786_vm15 = vcmp.eq.f32.partialorder %v4511_v47, 0.0  ;;  %p3161_p1 = pnand %p3160_p0, %p3335_p3  ;;  %p3168_p6 = por %p3167_p5, %p3166_p4 }
 0x215   : > { %v1769_v32 = vmul.f32 %v3035_v13, %v1718_v17  ;;  %v3037_v23 = vpop.eup %3036  ;;  %v4534_v7 = vmul.f32 %v1647_v12, %v4177_v14  ;;  %vm1777_vm0 = vcmp.eq.f32.partialorder %v4527_v4, inf  ;;  %vm1779_vm1 = vcmp.eq.f32.partialorder %v4527_v4, 0.0 }
 0x216   : > { %v4537_v3 = vmul.f32 %v1646_v55, %v4159_v42  ;;  %v1762_v30 = vmul.f32 %v3037_v23, %v4499_v15  ;;  %v1787_v55 = vand.u32 2147483648, %v4511_v47  ;;  %p3162_p2 = pneg %p3161_p1 }
 0x217   : > { %v1771_v49 = vsel %vm1770_vm10, %v1718_v17, %v1769_v32  ;;  %v4547_v14 = vsel %vm1714_vm4, %v4534_v7, 0.0  ;;  %v1975_v32 = vmul.f32 %v4522_v44, %v1753_v60 }
 0x218   : > { %v2673_v11 = vpop.f32.mrb[2].mxu1  ;;  %v1774_v0 = vsel %vm1772_vm11, %v1773_v61, %v1771_v49  ;;  %v1764_v17 = vsel %vm1763_vm12, %v4499_v15, %v1762_v30  ;;  %3046 = vrsqrt.f32 %v4547_v14  ;;  %v4564_v5 = vsel %vm1714_vm4, %v4537_v3, 0.0  ;;  %p3169_p7 = pnand %p3168_p6, %p3162_p2 }
 0x219   : > { %v4549_v42 = vpop.f32.mrb[3].mxu1  ;;  %v2015_v39 = vsel %vm2011_vm5, %v1774_v0, 0.0  ;;  %v1767_v45 = vsel %vm1765_vm13, %v1766_v58, %v1764_v17  ;;  %v1649_v61 = vsub.f32 1.0, %v2673_v11  ;;  %vm1798_vm2 = vcmp.eq.f32.partialorder %v4547_v14, inf }
 0x21a   : > { %v3039_v63 = vpop.eup %3038  ;;  %v2050_v50 = vmul.f32 1.442695, %v2015_v39  ;;  %v2014_v15 = vsel %vm2011_vm5, %v1767_v45, 0.0  ;;  %vm1800_vm3 = vcmp.eq.f32.partialorder %v4547_v14, 0.0  ;;  %vm1791_vm6 = vcmp.eq.f32.partialorder %v4564_v5, inf }
 0x21b   : > { %v1783_v52 = vmul.f32 %v3039_v63, %v4511_v47  ;;  %v2048_v18 = vmul.f32 1.442695, %v2014_v15  ;;  %v4596_v11 = vmul.f32 %v1649_v61, %v4216_v26  ;;  %vm1793_vm7 = vcmp.eq.f32.partialorder %v4564_v5, 0.0 }
 0x21c   : > { %v3041_v12 = vpop.eup %3040  ;;  %3048 = vpow2.f32 %v2050_v50 }
 0x21d   : > { %v2113_v37 = vmul.f32 %v3041_v12, %v4529_v36  ;;  %v1785_v13 = vsel %vm1784_vm14, %v4511_v47, %v1783_v52  ;;  %3050 = vrsqrt.f32 %v4564_v5  ;;  %v3043_v24 = vpop.eup %3042  ;;  %v4591_v47 = vmul.f32 %v4515_v46, %v4504_v43 }
 0x21e   : > { %3052 = vpow2.f32 %v2048_v18  ;;  %v4583_v23 = vsel %vm1786_vm15, %v1787_v55, %v1785_v13  ;;  %v2676_v49 = vpop.f32.mrb[4].mxu1  ;;  %v3045_v30 = vpop.eup %3044  ;;  %v2112_v39 = vmul.f32 %v3043_v24, %v4529_v36  ;;  %v1780_v52 = vand.u32 2147483648, %v4527_v4 }
 0x21f   : > { %v2145_v58 = vadd.f32 %v2113_v37, %v1976_v8  ;;  %v2017_v17 = vsel %vm2011_vm5, %v4583_v23, 0.0  ;;  %v1531_v63 = vpop.f32.mrb[5].mxu1  ;;  %v1776_v60 = vmul.f32 %v3045_v30, %v4527_v4  ;;  %v1648_v12 = vsub.f32 1.0, %v4549_v42 }
 0x220   : > { %v2054_v50 = vmul.f32 1.442695, %v2017_v17  ;;  %v2144_v15 = vadd.f32 %v2112_v39, %v1975_v32  ;;  %v4605_v43 = vsel %vm1714_vm4, %v4596_v11, 0.0  ;;  %v1651_v13 = vsub.f32 1.0, %v2676_v49 }
 0x221   : > { %v2213_v8 = vadd.f32 %v2181_v53, %v2145_v58  ;;  %v1778_v18 = vsel %vm1777_vm0, %v4527_v4, %v1776_v60  ;;  %v1978_v53 = vmul.f32 %v4522_v44, %v1774_v0  ;;  %v5517_v0 = vld [vmem:[#allocation10_spill] sm:$0xff]  ;;  %v1977_v39 = vmul.f32 %v4522_v44, %v1767_v45 }
 0x222   : > { %3054 = vpow2.f32 %v2054_v50  ;;  %v3047_v55 = vpop.eup %3046  ;;  %v2212_v26 = vadd.f32 %v2180_v35, %v2144_v15  ;;  %v4611_v42 = vsel %vm1779_vm1, %v1780_v52, %v1778_v18  ;;  %v1801_v35 = vand.u32 2147483648, %v4547_v14 }
 0x223   : > { %2245 = vst [vmem:[%s4607_s5 + $0x8] sm:$0xff] %v2213_v8  ;;  %3056 = vrsqrt.f32 %v4605_v43  ;;  %v2016_v4 = vsel %vm2011_vm5, %v4611_v42, 0.0  ;;  %v1797_v37 = vmul.f32 %v3047_v55, %v4547_v14  ;;  %v4625_v61 = vmul.f32 %v1648_v12, %v5517_v0 }
 0x224   : > { %2244 = vst [vmem:[%s4607_s5] sm:$0xff] %v2212_v26  ;;  %v2052_v32 = vmul.f32 1.442695, %v2016_v4  ;;  %v1650_v49 = vsub.f32 1.0, %v1531_v63  ;;  %v1794_v4 = vand.u32 2147483648, %v4564_v5  ;;  %vm1812_vm8 = vcmp.eq.f32.partialorder %v4605_v43, inf }
 0x225   : > { %v4619_v24 = vpop.f32.mrb[6].mxu1  ;;  %v1799_v17 = vsel %vm1798_vm2, %v4547_v14, %v1797_v37  ;;  %v4636_v15 = vsel %vm1714_vm4, %v4625_v61, 0.0  ;;  %v4643_v14 = vmul.f32 %v1651_v13, %v4261_v41  ;;  %vm1814_vm9 = vcmp.eq.f32.partialorder %v4605_v43, 0.0 }
 0x226   : > { %v4627_v30 = vpop.f32.mrb[7].mxu1  ;;  %v3049_v58 = vpop.eup %3048  ;;  %3058 = vpow2.f32 %v2052_v32  ;;  %v1802_v8 = vsel %vm1800_vm3, %v1801_v35, %v1799_v17  ;;  %v2184_v32 = vmul.f32 %v4515_v46, %v4520_v57  ;;  %v4658_v41 = vmul.f32 %v1650_v49, %v4247_v22 }
 0x227   : > { %v3051_v50 = vpop.eup %3050  ;;  %v2115_v60 = vmul.f32 %v3049_v58, %v4529_v36  ;;  %v2019_v12 = vsel %vm2011_vm5, %v1802_v8, 0.0  ;;  %3060 = vrsqrt.f32 %v4636_v15  ;;  %v1980_v17 = vmul.f32 %v4522_v44, %v4583_v23 }
 0x228   : > { %v3053_v52 = vpop.eup %3052  ;;  %v1790_v45 = vmul.f32 %v3051_v50, %v4564_v5  ;;  %v2058_v26 = vmul.f32 1.442695, %v2019_v12  ;;  %v1653_v22 = vsub.f32 1.0, %v4619_v24  ;;  %v1652_v24 = vsub.f32 1.0, %v4627_v30 }
 0x229   : > { %v4645_v63 = vpop.f32.mrb[8].mxu1  ;;  %v2147_v18 = vadd.f32 %v2115_v60, %v1978_v53  ;;  %v2114_v55 = vmul.f32 %v3053_v52, %v4529_v36  ;;  %v4681_v52 = vmul.f32 %v4515_v46, %v4534_v7  ;;  %v4695_v7 = vmul.f32 %v4515_v46, %v4537_v3 }
 0x22a   : > { %v4649_v37 = vpop.f32.mrb[9].mxu1  ;;  %v1792_v35 = vsel %vm1791_vm6, %v4564_v5, %v1790_v45  ;;  %3062 = vpow2.f32 %v2058_v26  ;;  %v4668_v5 = vsel %vm1714_vm4, %v4643_v14, 0.0  ;;  %v4708_v3 = vmul.f32 %v1653_v22, %v4295_v6 }
 0x22b   : > { %v2215_v53 = vadd.f32 %v4559_v34, %v2147_v18  ;;  %v2146_v13 = vadd.f32 %v2114_v55, %v1977_v39  ;;  %v1795_v0 = vsel %vm1793_vm7, %v1794_v4, %v1792_v35  ;;  %3064 = vrsqrt.f32 %v4668_v5 }
 0x22c   : > { %v3055_v58 = vpop.eup %3054  ;;  %v2018_v57 = vsel %vm2011_vm5, %v1795_v0, 0.0  ;;  %v4691_v18 = vsel %vm1714_vm4, %v4658_v41, 0.0  ;;  %v4726_v22 = vsel %vm1714_vm4, %v4708_v3, 0.0  ;;  %vm1805_vm10 = vcmp.eq.f32.partialorder %v4636_v15, inf }
 0x22d   : > { %v4671_v49 = vpop.f32.mrb[10].mxu1  ;;  %v3057_v34 = vpop.eup %3056  ;;  %2247 = vst [vmem:[%s4607_s5 + $0x18] sm:$0xff] %v2215_v53  ;;  %v2214_v39 = vadd.f32 %v4571_v10, %v2146_v13  ;;  %v2117_v50 = vmul.f32 %v3055_v58, %v4529_v36  ;;  %v2056_v23 = vmul.f32 1.442695, %v2018_v57  ;;  %v1815_v10 = vand.u32 2147483648, %v4605_v43 }
 0x22e   : > { %v4677_v60 = vpop.f32.mrb[11].mxu1  ;;  %v1811_v12 = vmul.f32 %v3057_v34, %v4605_v43  ;;  %v4705_v53 = vmul.f32 %v4515_v46, %v4596_v11  ;;  %v1982_v11 = vmul.f32 %v4522_v44, %v1802_v8  ;;  %vm1807_vm11 = vcmp.eq.f32.partialorder %v4636_v15, 0.0 }
 0x22f   : > { %2246 = vst [vmem:[%s4607_s5 + $0x10] sm:$0xff] %v2214_v39  ;;  %v2149_v45 = vadd.f32 %v2117_v50, %v1980_v17  ;;  %3066 = vpow2.f32 %v2056_v23  ;;  %v1808_v39 = vand.u32 2147483648, %v4636_v15  ;;  %vm1826_vm12 = vcmp.eq.f32.partialorder %v4668_v5, inf }
 0x230   : > { %v1813_v55 = vsel %vm1812_vm8, %v4605_v43, %v1811_v12  ;;  %3068 = vrsqrt.f32 %v4691_v18  ;;  %v3059_v26 = vpop.eup %3058  ;;  %v1979_v43 = vmul.f32 %v4522_v44, %v4611_v42  ;;  %vm1828_vm13 = vcmp.eq.f32.partialorder %v4668_v5, 0.0 }
 0x231   : > { %v4700_v30 = vpop.f32.mrb[12].mxu1  ;;  %v2217_v4 = vadd.f32 %v4591_v47, %v2149_v45  ;;  %v1816_v35 = vsel %vm1814_vm9, %v1815_v10, %v1813_v55  ;;  %v3061_v58 = vpop.eup %3060  ;;  %v2116_v17 = vmul.f32 %v3059_v26, %v4529_v36  ;;  %v4718_v47 = vmul.f32 %v1652_v24, %v4290_v21 }
 0x232   : > { %v4710_v13 = vpop.f32.mrb[13].mxu1  ;;  %v2021_v57 = vsel %vm2011_vm5, %v1816_v35, 0.0  ;;  %v1804_v6 = vmul.f32 %v3061_v58, %v4636_v15  ;;  %3070 = vrsqrt.f32 %v4726_v22  ;;  %v1981_v26 = vmul.f32 %v4522_v44, %v1795_v0 }
 0x233   : > { %2249 = vst [vmem:[%s4607_s5 + $0x28] sm:$0xff] %v2217_v4  ;;  %v2062_v34 = vmul.f32 1.442695, %v2021_v57  ;;  %v2148_v42 = vadd.f32 %v2116_v17, %v1979_v43  ;;  %v4738_v23 = vsel %vm1714_vm4, %v4718_v47, 0.0  ;;  %v1829_v43 = vand.u32 2147483648, %v4668_v5 }
 0x234   : > { %v3063_v50 = vpop.eup %3062  ;;  %v1806_v8 = vsel %vm1805_vm10, %v4636_v15, %v1804_v6  ;;  %vm1819_vm14 = vcmp.eq.f32.partialorder %v4691_v18, inf  ;;  %vm1821_vm15 = vcmp.eq.f32.partialorder %v4691_v18, 0.0  ;;  %v1655_v0 = vsub.f32 1.0, %v4645_v63 }
 0x235   : > { %v4731_v21 = vpop.f32.mrb[14].mxu1  ;;  %3072 = vpow2.f32 %v2062_v34  ;;  %v2216_v24 = vadd.f32 %v2184_v32, %v2148_v42  ;;  %v2119_v45 = vmul.f32 %v3063_v50, %v4529_v36  ;;  %v4743_v10 = vsel %vm1807_vm11, %v1808_v39, %v1806_v8  ;;  %v3065_v55 = vpop.eup %3064 }
 0x236   : > { %v4740_v12 = vpop.f32.mrb[15].mxu1  ;;  %3074 = vrsqrt.f32 %v4738_v23  ;;  %v2020_v15 = vsel %vm2011_vm5, %v4743_v10, 0.0  ;;  %v1825_v58 = vmul.f32 %v3065_v55, %v4668_v5  ;;  %v1654_v34 = vsub.f32 1.0, %v4649_v37 }
 0x237   : > { %2248 = vst [vmem:[%s4607_s5 + $0x20] sm:$0xff] %v2216_v24  ;;  %v2151_v4 = vadd.f32 %v2119_v45, %v1982_v11  ;;  %v2060_v32 = vmul.f32 1.442695, %v2020_v15  ;;  %v1822_v37 = vand.u32 2147483648, %v4691_v18  ;;  %v4775_v24 = vmul.f32 %v1655_v0, %v4316_v2 }
 0x238   : > { %v1827_v50 = vsel %vm1826_vm12, %v4668_v5, %v1825_v58  ;;  %v1984_v45 = vmul.f32 %v4522_v44, %v1816_v35  ;;  %vm1840_vm0 = vcmp.eq.f32.partialorder %v4726_v22, inf  ;;  %v4794_v35 = vmul.f32 %v1654_v34, %v4305_v40 }
 0x239   : > { %v4755_v17 = vpop.f32.mrb[16].mxu1  ;;  %v3067_v57 = vpop.eup %3066  ;;  %v2219_v42 = vadd.f32 %v4681_v52, %v2151_v4  ;;  %3076 = vpow2.f32 %v2060_v32  ;;  %v4770_v8 = vsel %vm1828_vm13, %v1829_v43, %v1827_v50  ;;  %v4791_v2 = vsel %vm1714_vm4, %v4775_v24, 0.0 }
 0x23a   : > { %v4761_v6 = vpop.f32.mrb[17].mxu1  ;;  %v3069_v11 = vpop.eup %3068  ;;  %v2118_v39 = vmul.f32 %v3067_v57, %v4529_v36  ;;  %v2023_v55 = vsel %vm2011_vm5, %v4770_v8, 0.0  ;;  %3078 = vrsqrt.f32 %v4791_v2  ;;  %v1657_v57 = vsub.f32 1.0, %v4671_v49 }
 0x23b   : > { %v1818_v63 = vmul.f32 %v3069_v11, %v4691_v18  ;;  %2251 = vst [vmem:[%s4607_s5 + $0x38] sm:$0xff] %v2219_v42  ;;  %v2066_v15 = vmul.f32 1.442695, %v2023_v55  ;;  %vm1842_vm1 = vcmp.eq.f32.partialorder %v4726_v22, 0.0  ;;  %vm1833_vm2 = vcmp.eq.f32.partialorder %v4738_v23, inf }
 0x23c   : > { %v2150_v52 = vadd.f32 %v2118_v39, %v1981_v26  ;;  %v3071_v32 = vpop.eup %3070  ;;  %v1836_v50 = vand.u32 2147483648, %v4738_v23  ;;  %v4822_v55 = vmul.f32 %v1657_v57, %v4335_v33  ;;  %vm1835_vm3 = vcmp.eq.f32.partialorder %v4738_v23, 0.0 }
 0x23d   : > { %v4783_v5 = vpop.f32.mrb[18].mxu1  ;;  %v1820_v4 = vsel %vm1819_vm14, %v4691_v18, %v1818_v63  ;;  %3080 = vpow2.f32 %v2066_v15  ;;  %v1839_v40 = vmul.f32 %v3071_v32, %v4726_v22  ;;  %v1843_v18 = vand.u32 2147483648, %v4726_v22 }
 0x23e   : > { %v4796_v26 = vpop.f32.mrb[19].mxu1  ;;  %v2218_v58 = vadd.f32 %v4695_v7, %v2150_v52  ;;  %v1823_v43 = vsel %vm1821_vm15, %v1822_v37, %v1820_v4  ;;  %v4819_v63 = vsel %vm1714_vm4, %v4794_v35, 0.0  ;;  %v2188_v33 = vmul.f32 %v4515_v46, %v4625_v61 }
 0x23f   : > { %v3073_v0 = vpop.eup %3072  ;;  %v2022_v11 = vsel %vm2011_vm5, %v1823_v43, 0.0  ;;  %v1841_v49 = vsel %vm1840_vm0, %v4726_v22, %v1839_v40  ;;  %v4849_v61 = vsel %vm1714_vm4, %v4822_v55, 0.0  ;;  %vm1854_vm6 = vcmp.eq.f32.partialorder %v4791_v2, inf }
 0x240   : > { %v3075_v34 = vpop.eup %3074  ;;  %2250 = vst [vmem:[%s4607_s5 + $0x30] sm:$0xff] %v2218_v58  ;;  %v2121_v7 = vmul.f32 %v3073_v0, %v4529_v36  ;;  %v2064_v42 = vmul.f32 1.442695, %v2022_v11  ;;  %v1844_v52 = vsel %vm1842_vm1, %v1843_v18, %v1841_v49  ;;  %v1983_v11 = vmul.f32 %v4522_v44, %v4743_v10 }
 0x241   : > { %v1832_v39 = vmul.f32 %v3075_v34, %v4738_v23  ;;  %v2025_v22 = vsel %vm2011_vm5, %v1844_v52, 0.0  ;;  %v1656_v49 = vsub.f32 1.0, %v4677_v60  ;;  %vm1856_vm7 = vcmp.eq.f32.partialorder %v4791_v2, 0.0 }
 0x242   : > { %v2153_v37 = vadd.f32 %v2121_v7, %v1984_v45  ;;  %3082 = vpow2.f32 %v2064_v42  ;;  %v2070_v57 = vmul.f32 1.442695, %v2025_v22  ;;  %v4853_v42 = vmul.f32 %v4515_v46, %v4708_v3 }
 0x243   : > { %v1834_v4 = vsel %vm1833_vm2, %v4738_v23, %v1832_v39  ;;  %3084 = vrsqrt.f32 %v4819_v63  ;;  %v3077_v45 = vpop.eup %3076  ;;  %v2191_v23 = vmul.f32 %v4515_v46, %v4643_v14  ;;  %v4857_v14 = vmul.f32 %v4515_v46, %v4718_v47 }
 0x244   : > { %v4824_v15 = vpop.f32.mrb[20].mxu1  ;;  %v2221_v58 = vadd.f32 %v4705_v53, %v2153_v37  ;;  %v1837_v0 = vsel %vm1835_vm3, %v1836_v50, %v1834_v4  ;;  %v2120_v40 = vmul.f32 %v3077_v45, %v4529_v36  ;;  %v2190_v53 = vmul.f32 %v4515_v46, %v4658_v41  ;;  %v3079_v18 = vpop.eup %3078 }
 0x245   : > { %v4831_v32 = vpop.f32.mrb[21].mxu1  ;;  %v2024_v34 = vsel %vm2011_vm5, %v1837_v0, 0.0  ;;  %3086 = vpow2.f32 %v2070_v57  ;;  %v1986_v41 = vmul.f32 %v4522_v44, %v4770_v8  ;;  %v1659_v39 = vsub.f32 1.0, %v4700_v30 }
 0x246   : > { %2253 = vst [vmem:[%s4607_s5 + $0x48] sm:$0xff] %v2221_v58  ;;  %v2068_v7 = vmul.f32 1.442695, %v2024_v34  ;;  %v2152_v10 = vadd.f32 %v2120_v40, %v1983_v11  ;;  %3088 = vrsqrt.f32 %v4849_v61  ;;  %v1985_v22 = vmul.f32 %v4522_v44, %v1823_v43 }
 0x247   : > { %v3081_v3 = vpop.eup %3080  ;;  %v1853_v47 = vmul.f32 %v3079_v18, %v4791_v2  ;;  %v1857_v60 = vand.u32 2147483648, %v4791_v2  ;;  %v4875_v30 = vmul.f32 %v1656_v49, %v4321_v54  ;;  %vm1847_vm8 = vcmp.eq.f32.partialorder %v4819_v63, inf }
 0x248   : > { %3090 = vpow2.f32 %v2068_v7  ;;  %v2220_v37 = vadd.f32 %v2188_v33, %v2152_v10  ;;  %v2123_v45 = vmul.f32 %v3081_v3, %v4529_v36  ;;  %v4881_v43 = vmul.f32 %v1659_v39, %v4350_v25 }
 0x249   : > { %v4864_v50 = vpop.f32.mrb[22].mxu1  ;;  %v1855_v8 = vsel %vm1854_vm6, %v4791_v2, %v1853_v47  ;;  %v1658_v58 = vsub.f32 1.0, %v4710_v13  ;;  %v4889_v40 = vsel %vm1714_vm4, %v4875_v30, 0.0  ;;  %v1661_v54 = vsub.f32 1.0, %v4731_v21 }
 0x24a   : > { %v4869_v4 = vpop.f32.mrb[23].mxu1  ;;  %2252 = vst [vmem:[%s4607_s5 + $0x40] sm:$0xff] %v2220_v37  ;;  %v2155_v57 = vadd.f32 %v2123_v45, %v1986_v41  ;;  %v4884_v11 = vsel %vm1856_vm7, %v1857_v60, %v1855_v8  ;;  %v1988_v25 = vmul.f32 %v4522_v44, %v1844_v52  ;;  %3092 = vrsqrt.f32 %v4889_v40 }
 0x24b   : > { %v2027_v13 = vsel %vm2011_vm5, %v4884_v11, 0.0  ;;  %vm1849_vm9 = vcmp.eq.f32.partialorder %v4819_v63, 0.0  ;;  %v1987_v49 = vmul.f32 %v4522_v44, %v1837_v0  ;;  %v1850_v39 = vand.u32 2147483648, %v4819_v63 }
 0x24c   : > { %v3083_v33 = vpop.eup %3082  ;;  %v2223_v7 = vadd.f32 %v2191_v23, %v2155_v57  ;;  %v2074_v10 = vmul.f32 1.442695, %v2027_v13  ;;  %v4907_v52 = vsel %vm1714_vm4, %v4881_v43, 0.0  ;;  %v4919_v0 = vmul.f32 %v1661_v54, %v4372_v1 }
 0x24d   : > { %v3085_v34 = vpop.eup %3084  ;;  %v2122_v2 = vmul.f32 %v3083_v33, %v4529_v36  ;;  %vm1868_vm10 = vcmp.eq.f32.partialorder %v4849_v61, inf  ;;  %vm1870_vm11 = vcmp.eq.f32.partialorder %v4849_v61, 0.0  ;;  %vm1861_vm12 = vcmp.eq.f32.partialorder %v4889_v40, inf }
 0x24e   : > { %v1846_v18 = vmul.f32 %v3085_v34, %v4819_v63  ;;  %2255 = vst [vmem:[%s4607_s5 + $0x58] sm:$0xff] %v2223_v7  ;;  %3094 = vpow2.f32 %v2074_v10  ;;  %vm1863_vm13 = vcmp.eq.f32.partialorder %v4889_v40, 0.0  ;;  %vm1882_vm14 = vcmp.eq.f32.partialorder %v4907_v52, inf }
 0x24f   : > { %v4900_v41 = vpop.f32.mrb[24].mxu1  ;;  %v2154_v21 = vadd.f32 %v2122_v2, %v1985_v22  ;;  %v3087_v23 = vpop.eup %3086  ;;  %v4916_v22 = vmul.f32 %v1658_v58, %v4339_v29  ;;  %3096 = vrsqrt.f32 %v4907_v52  ;;  %v4942_v2 = vsel %vm1714_vm4, %v4919_v0, 0.0 }
 0x250   : > { %v4909_v3 = vpop.f32.mrb[25].mxu1  ;;  %v1848_v37 = vsel %vm1847_vm8, %v4819_v63, %v1846_v18  ;;  %v3089_v47 = vpop.eup %3088  ;;  %v2125_v60 = vmul.f32 %v3087_v23, %v4529_v36  ;;  %v1871_v63 = vand.u32 2147483648, %v4849_v61  ;;  %v1663_v18 = vsub.f32 1.0, %v4755_v17 }
 0x251   : > { %v2222_v45 = vadd.f32 %v2190_v53, %v2154_v21  ;;  %v1851_v8 = vsel %vm1849_vm9, %v1850_v39, %v1848_v37  ;;  %v1867_v34 = vmul.f32 %v3089_v47, %v4849_v61  ;;  %v4937_v54 = vsel %vm1714_vm4, %v4916_v22, 0.0 }
 0x252   : > { %v3091_v33 = vpop.eup %3090  ;;  %v2026_v57 = vsel %vm2011_vm5, %v1851_v8, 0.0  ;;  %v2157_v29 = vadd.f32 %v2125_v60, %v1988_v25  ;;  %v1660_v25 = vsub.f32 1.0, %v4740_v12  ;;  %v2195_v12 = vmul.f32 %v4515_v46, %v4775_v24 }
 0x253   : > { %2254 = vst [vmem:[%s4607_s5 + $0x50] sm:$0xff] %v2222_v45  ;;  %v2124_v1 = vmul.f32 %v3091_v33, %v4529_v36  ;;  %v2072_v53 = vmul.f32 1.442695, %v2026_v57  ;;  %v1869_v58 = vsel %vm1868_vm10, %v4849_v61, %v1867_v34  ;;  %v4958_v23 = vmul.f32 %v4515_v46, %v4822_v55 }
 0x254   : > { %v2225_v13 = vadd.f32 %v4853_v42, %v2157_v29  ;;  %v1872_v10 = vsel %vm1870_vm11, %v1871_v63, %v1869_v58  ;;  %v3093_v21 = vpop.eup %3092  ;;  %v2194_v42 = vmul.f32 %v4515_v46, %v4794_v35  ;;  %v4963_v17 = vmul.f32 %v4515_v46, %v4875_v30 }
 0x255   : > { %v2156_v7 = vadd.f32 %v2124_v1, %v1987_v49  ;;  %3098 = vpow2.f32 %v2072_v53  ;;  %v2029_v61 = vsel %vm2011_vm5, %v1872_v10, 0.0  ;;  %v1860_v37 = vmul.f32 %v3093_v21, %v4889_v40 }
 0x256   : > { %3100 = vrsqrt.f32 %v4937_v54  ;;  %2257 = vst [vmem:[%s4607_s5 + $0x68] sm:$0xff] %v2225_v13  ;;  %v2078_v49 = vmul.f32 1.442695, %v2029_v61  ;;  %v1864_v24 = vand.u32 2147483648, %v4889_v40  ;;  %v4970_v35 = vmul.f32 %v1660_v25, %v4354_v38 }
 0x257   : > { %v2224_v39 = vadd.f32 %v4857_v14, %v2156_v7  ;;  %3102 = vrsqrt.f32 %v4942_v2  ;;  %v1990_v55 = vmul.f32 %v4522_v44, %v4884_v11  ;;  %v1862_v47 = vsel %vm1861_vm12, %v4889_v40, %v1860_v37 }
 0x258   : > { %3104 = vpow2.f32 %v2078_v49  ;;  %v3095_v14 = vpop.eup %3094  ;;  %v4977_v30 = vmul.f32 %v1663_v18, %v4394_v20  ;;  %v4980_v33 = vsel %vm1863_vm13, %v1864_v24, %v1862_v47  ;;  %v4986_v38 = vsel %vm1714_vm4, %v4970_v35, 0.0 }
 0x259   : > { %2256 = vst [vmem:[%s4607_s5 + $0x60] sm:$0xff] %v2224_v39  ;;  %v3097_v45 = vpop.eup %3096  ;;  %v2127_v60 = vmul.f32 %v3095_v14, %v4529_v36  ;;  %v2028_v11 = vsel %vm2011_vm5, %v4980_v33, 0.0  ;;  %vm1884_vm15 = vcmp.eq.f32.partialorder %v4907_v52, 0.0  ;;  %3106 = vrsqrt.f32 %v4986_v38 }
 0x25a   : > { %v1881_v40 = vmul.f32 %v3097_v45, %v4907_v52  ;;  %v1989_v57 = vmul.f32 %v4522_v44, %v1851_v8  ;;  %v2076_v34 = vmul.f32 1.442695, %v2028_v11  ;;  %v1885_v29 = vand.u32 2147483648, %v4907_v52 }
 0x25b   : > { %v2159_v20 = vadd.f32 %v2127_v60, %v1990_v55  ;;  %v1992_v1 = vmul.f32 %v4522_v44, %v1872_v10  ;;  %v5001_v63 = vsel %vm1714_vm4, %v4977_v30, 0.0  ;;  %v1662_v58 = vsub.f32 1.0, %v4761_v6 }
 0x25c   : > { %v1883_v53 = vsel %vm1882_vm14, %v4907_v52, %v1881_v40  ;;  %3108 = vpow2.f32 %v2076_v34  ;;  %vm1875_vm0 = vcmp.eq.f32.partialorder %v4937_v54, inf  ;;  %vm1877_vm1 = vcmp.eq.f32.partialorder %v4937_v54, 0.0 }
 0x25d   : > { %v2227_v13 = vadd.f32 %v2195_v12, %v2159_v20  ;;  %v1886_v7 = vsel %vm1884_vm15, %v1885_v29, %v1883_v53  ;;  %3110 = vrsqrt.f32 %v5001_v63  ;;  %v1878_v18 = vand.u32 2147483648, %v4937_v54 }
 0x25e   : > { %v2031_v10 = vsel %vm2011_vm5, %v1886_v7, 0.0  ;;  %v1665_v21 = vsub.f32 1.0, %v4783_v5  ;;  %vm1896_vm2 = vcmp.eq.f32.partialorder %v4942_v2, inf  ;;  %vm1898_vm3 = vcmp.eq.f32.partialorder %v4942_v2, 0.0 }
 0x25f   : > { %v3099_v25 = vpop.eup %3098  ;;  %2259 = vst [vmem:[%s4607_s5 + $0x78] sm:$0xff] %v2227_v13  ;;  %v2082_v52 = vmul.f32 1.442695, %v2031_v10  ;;  %v5017_v49 = vmul.f32 %v1662_v58, %v4376_v28  ;;  %v1899_v5 = vand.u32 2147483648, %v4942_v2  ;;  %v2199_v20 = vmul.f32 %v4515_v46, %v4881_v43 }
 0x260   : > { %v3101_v8 = vpop.eup %3100  ;;  %v2126_v61 = vmul.f32 %v3099_v25, %v4529_v36  ;;  %vm1889_vm6 = vcmp.eq.f32.partialorder %v4986_v38, inf  ;;  %vm1891_vm7 = vcmp.eq.f32.partialorder %v4986_v38, 0.0  ;;  %v1892_v43 = vand.u32 2147483648, %v4986_v38 }
 0x261   : > { %v1874_v6 = vmul.f32 %v3101_v8, %v4937_v54  ;;  %v3103_v39 = vpop.eup %3102  ;;  %3112 = vpow2.f32 %v2082_v52  ;;  %v5032_v28 = vsel %vm1714_vm4, %v5017_v49, 0.0  ;;  %v1664_v13 = vsub.f32 1.0, %v4796_v26 }
 0x262   : > { %v2158_v12 = vadd.f32 %v2126_v61, %v1989_v57  ;;  %v3105_v37 = vpop.eup %3104  ;;  %v1895_v14 = vmul.f32 %v3103_v39, %v4942_v2  ;;  %3114 = vrsqrt.f32 %v5032_v28  ;;  %v1667_v8 = vsub.f32 1.0, %v4824_v15 }
 0x263   : > { %v1876_v24 = vsel %vm1875_vm0, %v4937_v54, %v1874_v6  ;;  %v2129_v47 = vmul.f32 %v3105_v37, %v4529_v36  ;;  %v3107_v40 = vpop.eup %3106  ;;  %vm1910_vm8 = vcmp.eq.f32.partialorder %v5001_v63, inf  ;;  %v1994_v15 = vmul.f32 %v4522_v44, %v1886_v7 }
 0x264   : > { %v2226_v55 = vadd.f32 %v2194_v42, %v2158_v12  ;;  %v5027_v45 = vsel %vm1877_vm1, %v1878_v18, %v1876_v24  ;;  %v1897_v11 = vsel %vm1896_vm2, %v4942_v2, %v1895_v14  ;;  %v5040_v42 = vmul.f32 %v1665_v21, %v4412_v27 }
 0x265   : > { %v2030_v60 = vsel %vm2011_vm5, %v5027_v45, 0.0  ;;  %v2161_v54 = vadd.f32 %v2129_v47, %v1992_v1  ;;  %v1900_v34 = vsel %vm1898_vm3, %v1899_v5, %v1897_v11  ;;  %v1888_v53 = vmul.f32 %v3107_v40, %v4986_v38 }
 0x266   : > { %2258 = vst [vmem:[%s4607_s5 + $0x70] sm:$0xff] %v2226_v55  ;;  %v2080_v57 = vmul.f32 1.442695, %v2030_v60  ;;  %v2033_v29 = vsel %vm2011_vm5, %v1900_v34, 0.0  ;;  %v3109_v58 = vpop.eup %3108  ;;  %v5058_v25 = vsel %vm1714_vm4, %v5040_v42, 0.0  ;;  %vm1912_vm9 = vcmp.eq.f32.partialorder %v5001_v63, 0.0 }
 0x267   : > { %v2229_v27 = vadd.f32 %v4958_v23, %v2161_v54  ;;  %v2086_v1 = vmul.f32 1.442695, %v2033_v29  ;;  %v1890_v2 = vsel %vm1889_vm6, %v4986_v38, %v1888_v53  ;;  %v3111_v61 = vpop.eup %3110  ;;  %v1991_v23 = vmul.f32 %v4522_v44, %v4980_v33 }
 0x268   : > { %3116 = vpow2.f32 %v2080_v57  ;;  %v2128_v10 = vmul.f32 %v3109_v58, %v4529_v36  ;;  %v5066_v52 = vsel %vm1891_vm7, %v1892_v43, %v1890_v2  ;;  %v1909_v6 = vmul.f32 %v3111_v61, %v5001_v63 }
 0x269   : > { %2261 = vst [vmem:[%s4607_s5 + $0x88] sm:$0xff] %v2229_v27  ;;  %3118 = vpow2.f32 %v2086_v1  ;;  %v2032_v38 = vsel %vm2011_vm5, %v5066_v52, 0.0  ;;  %v1913_v33 = vand.u32 2147483648, %v5001_v63  ;;  %v5079_v12 = vmul.f32 %v1664_v13, %v4406_v16 }
 0x26a   : > { %3120 = vrsqrt.f32 %v5058_v25  ;;  %v2160_v26 = vadd.f32 %v2128_v10, %v1991_v23  ;;  %v2084_v18 = vmul.f32 1.442695, %v2032_v38  ;;  %v1911_v39 = vsel %vm1910_vm8, %v5001_v63, %v1909_v6 }
 0x26b   : > { %v3113_v21 = vpop.eup %3112  ;;  %v5082_v37 = vmul.f32 %v1667_v8, %v4434_v56  ;;  %v1914_v7 = vsel %vm1912_vm9, %v1913_v33, %v1911_v39  ;;  %v2198_v55 = vmul.f32 %v4515_v46, %v4916_v22  ;;  %v2201_v47 = vmul.f32 %v4515_v46, %v4919_v0 }
 0x26c   : > { %v2228_v24 = vadd.f32 %v4963_v17, %v2160_v26  ;;  %v2131_v14 = vmul.f32 %v3113_v21, %v4529_v36  ;;  %3122 = vpow2.f32 %v2084_v18  ;;  %v3115_v5 = vpop.eup %3114  ;;  %v2035_v16 = vsel %vm2011_vm5, %v1914_v7, 0.0 }
 0x26d   : > { %v5095_v56 = vsel %vm1714_vm4, %v5079_v12, 0.0  ;;  %v2090_v63 = vmul.f32 1.442695, %v2035_v16  ;;  %v1902_v60 = vmul.f32 %v3115_v5, %v5032_v28  ;;  %vm1903_vm10 = vcmp.eq.f32.partialorder %v5032_v28, inf }
 0x26e   : > { %2260 = vst [vmem:[%s4607_s5 + $0x80] sm:$0xff] %v2228_v24  ;;  %v2163_v17 = vadd.f32 %v2131_v14, %v1994_v15  ;;  %3124 = vrsqrt.f32 %v5095_v56  ;;  %v1906_v22 = vand.u32 2147483648, %v5032_v28  ;;  %v5105_v0 = vsel %vm1714_vm4, %v5082_v37, 0.0 }
 0x26f   : > { %v1666_v11 = vsub.f32 1.0, %v4831_v32  ;;  %3126 = vpow2.f32 %v2090_v63  ;;  %v1904_v57 = vsel %vm1903_vm10, %v5032_v28, %v1902_v60  ;;  %vm1905_vm11 = vcmp.eq.f32.partialorder %v5032_v28, 0.0 }
 0x270   : > { %v2231_v54 = vadd.f32 %v2199_v20, %v2163_v17  ;;  %v1993_v29 = vmul.f32 %v4522_v44, %v5027_v45  ;;  %v5113_v27 = vsel %vm1905_vm11, %v1906_v22, %v1904_v57  ;;  %3128 = vrsqrt.f32 %v5105_v0 }
 0x271   : > { %v1996_v32 = vmul.f32 %v4522_v44, %v1900_v34  ;;  %v2200_v20 = vmul.f32 %v4515_v46, %v4970_v35  ;;  %v2203_v43 = vmul.f32 %v4515_v46, %v4977_v30  ;;  %v2034_v45 = vsel %vm2011_vm5, %v5113_v27, 0.0 }
 0x272   : > { %v3117_v40 = vpop.eup %3116  ;;  %2263 = vst [vmem:[%s4607_s5 + $0x98] sm:$0xff] %v2231_v54  ;;  %v2088_v13 = vmul.f32 1.442695, %v2034_v45  ;;  %v5127_v8 = vmul.f32 %v1666_v11, %v4429_v19  ;;  %vm1924_vm12 = vcmp.eq.f32.partialorder %v5058_v25, inf  ;;  %v1927_v35 = vand.u32 2147483648, %v5058_v25 }
 0x273   : > { %v2130_v53 = vmul.f32 %v3117_v40, %v4529_v36  ;;  %v3119_v1 = vpop.eup %3118  ;;  %v1669_v30 = vsub.f32 1.0, %v4864_v50  ;;  %vm1926_vm13 = vcmp.eq.f32.partialorder %v5058_v25, 0.0  ;;  %v1668_v6 = vsub.f32 1.0, %v4869_v4 }
 0x274   : > { %v3121_v28 = vpop.eup %3120  ;;  %v2133_v2 = vmul.f32 %v3119_v1, %v4529_v36  ;;  %3130 = vpow2.f32 %v2088_v13  ;;  %v5136_v10 = vsel %vm1714_vm4, %v5127_v8, 0.0  ;;  %v1995_v26 = vmul.f32 %v4522_v44, %v5066_v52 }
 0x275   : > { %v2162_v58 = vadd.f32 %v2130_v53, %v1993_v29  ;;  %v1923_v34 = vmul.f32 %v3121_v28, %v5058_v25  ;;  %3132 = vrsqrt.f32 %v5136_v10  ;;  %v1998_v21 = vmul.f32 %v4522_v44, %v1914_v7 }
 0x276   : > { %v2165_v23 = vadd.f32 %v2133_v2, %v1996_v32  ;;  %v3123_v38 = vpop.eup %3122  ;;  %vm1917_vm14 = vcmp.eq.f32.partialorder %v5095_v56, inf  ;;  %v5154_v4 = vmul.f32 %v1669_v30, %v4456_v31  ;;  %vm1919_vm15 = vcmp.eq.f32.partialorder %v5095_v56, 0.0 }
 0x277   : > { %v2230_v61 = vadd.f32 %v2198_v55, %v2162_v58  ;;  %v1925_v19 = vsel %vm1924_vm12, %v5058_v25, %v1923_v34  ;;  %v2132_v15 = vmul.f32 %v3123_v38, %v4529_v36  ;;  %v1920_v7 = vand.u32 2147483648, %v5095_v56 }
 0x278   : > { %v2233_v50 = vadd.f32 %v2201_v47, %v2165_v23  ;;  %v5146_v18 = vsel %vm1926_vm13, %v1927_v35, %v1925_v19  ;;  %v3125_v33 = vpop.eup %3124  ;;  %v5163_v5 = vsel %vm1714_vm4, %v5154_v4, 0.0  ;;  %v5166_v55 = vmul.f32 %v1668_v6, %v4451_v48 }
 0x279   : > { %2262 = vst [vmem:[%s4607_s5 + $0x90] sm:$0xff] %v2230_v61  ;;  %v2037_v25 = vsel %vm2011_vm5, %v5146_v18, 0.0  ;;  %v2164_v39 = vadd.f32 %v2132_v15, %v1995_v26  ;;  %v1916_v52 = vmul.f32 %v3125_v33, %v5095_v56  ;;  %v3127_v14 = vpop.eup %3126  ;;  %v1671_v31 = vsub.f32 1.0, %v4900_v41 }
 0x27a   : > { %2265 = vst [vmem:[%s4607_s5 + $0xa8] sm:$0xff] %v2233_v50  ;;  %v2094_v24 = vmul.f32 1.442695, %v2037_v25  ;;  %v3129_v47 = vpop.eup %3128  ;;  %v2135_v17 = vmul.f32 %v3127_v14, %v4529_v36  ;;  %vm1938_vm0 = vcmp.eq.f32.partialorder %v5105_v0, inf  ;;  %vm1940_vm1 = vcmp.eq.f32.partialorder %v5105_v0, 0.0 }
 0x27b   : > { %v2232_v16 = vadd.f32 %v2200_v20, %v2164_v39  ;;  %v1918_v63 = vsel %vm1917_vm14, %v5095_v56, %v1916_v52  ;;  %v1937_v22 = vmul.f32 %v3129_v47, %v5105_v0  ;;  %v1941_v11 = vand.u32 2147483648, %v5105_v0 }
 0x27c   : > { %3134 = vpow2.f32 %v2094_v24  ;;  %v1921_v60 = vsel %vm1919_vm15, %v1920_v7, %v1918_v63  ;;  %v2167_v48 = vadd.f32 %v2135_v17, %v1998_v21  ;;  %v5185_v54 = vsel %vm1714_vm4, %v5166_v55, 0.0 }
 0x27d   : > { %3136 = vrsqrt.f32 %v5163_v5  ;;  %2264 = vst [vmem:[%s4607_s5 + $0xa0] sm:$0xff] %v2232_v16  ;;  %v2036_v41 = vsel %vm2011_vm5, %v1921_v60, 0.0  ;;  %v1939_v56 = vsel %vm1938_vm0, %v5105_v0, %v1937_v22  ;;  %v5188_v57 = vmul.f32 %v1671_v31, %v4464_v59 }
 0x27e   : > { %v2092_v40 = vmul.f32 1.442695, %v2036_v41  ;;  %v3131_v29 = vpop.eup %3130  ;;  %v2235_v53 = vadd.f32 %v2203_v43, %v2167_v48  ;;  %v1942_v1 = vsel %vm1940_vm1, %v1941_v11, %v1939_v56  ;;  %3138 = vrsqrt.f32 %v5185_v54 }
 0x27f   : > { %v3133_v32 = vpop.eup %3132  ;;  %v1997_v20 = vmul.f32 %v4522_v44, %v5113_v27  ;;  %v2134_v45 = vmul.f32 %v3131_v29, %v4529_v36  ;;  %v2039_v0 = vsel %vm2011_vm5, %v1942_v1, 0.0  ;;  %v2202_v59 = vmul.f32 %v4515_v46, %v5017_v49 }
 0x280   : > { %3140 = vpow2.f32 %v2092_v40  ;;  %2267 = vst [vmem:[%s4607_s5 + $0xb8] sm:$0xff] %v2235_v53  ;;  %v2098_v28 = vmul.f32 1.442695, %v2039_v0  ;;  %v1930_v43 = vmul.f32 %v3133_v32, %v5136_v10  ;;  %v1670_v58 = vsub.f32 1.0, %v4909_v3 }
 0x281   : > { %v2166_v2 = vadd.f32 %v2134_v45, %v1997_v20  ;;  %vm1931_vm2 = vcmp.eq.f32.partialorder %v5136_v10, inf  ;;  %v1934_v27 = vand.u32 2147483648, %v5136_v10  ;;  %v5206_v13 = vsel %vm1714_vm4, %v5188_v57, 0.0 }
 0x282   : > { %3142 = vpow2.f32 %v2098_v28  ;;  %v1932_v34 = vsel %vm1931_vm2, %v5136_v10, %v1930_v43  ;;  %vm1933_vm3 = vcmp.eq.f32.partialorder %v5136_v10, 0.0  ;;  %v5214_v61 = vmul.f32 %v1670_v58, %v4462_v9 }
 0x283   : > { %v2234_v49 = vadd.f32 %v2202_v59, %v2166_v2  ;;  %v1935_v35 = vsel %vm1933_vm3, %v1934_v27, %v1932_v34  ;;  %3144 = vrsqrt.f32 %v5206_v13  ;;  %v2000_v38 = vmul.f32 %v4522_v44, %v5146_v18 }
 0x284   : > { %v2038_v30 = vsel %vm2011_vm5, %v1935_v35, 0.0  ;;  %v2205_v10 = vmul.f32 %v4515_v46, %v5040_v42  ;;  %v1745_v26 = vsel %vm1714_vm4, %v5214_v61, 0.0  ;;  %vm1952_vm6 = vcmp.eq.f32.partialorder %v5163_v5, inf }
 0x285   : > { %2266 = vst [vmem:[%s4607_s5 + $0xb0] sm:$0xff] %v2234_v49  ;;  %v2096_v6 = vmul.f32 1.442695, %v2038_v30  ;;  %v1955_v9 = vand.u32 2147483648, %v5163_v5  ;;  %vm1954_vm7 = vcmp.eq.f32.partialorder %v5163_v5, 0.0  ;;  %v1999_v25 = vmul.f32 %v4522_v44, %v1921_v60 }
 0x286   : > { %v3135_v3 = vpop.eup %3134  ;;  %vm1945_vm4 = vcmp.eq.f32.partialorder %v5185_v54, inf  ;;  %v1948_v14 = vand.u32 2147483648, %v5185_v54  ;;  %vm1947_vm8 = vcmp.eq.f32.partialorder %v5185_v54, 0.0  ;;  %v2204_v16 = vmul.f32 %v4515_v46, %v5079_v12 }
 0x287   : > { %v3137_v23 = vpop.eup %3136  ;;  %v2137_v19 = vmul.f32 %v3135_v3, %v4529_v36  ;;  %3146 = vpow2.f32 %v2096_v6  ;;  %v2002_v60 = vmul.f32 %v4522_v44, %v1942_v1  ;;  %vm1966_vm9 = vcmp.eq.f32.partialorder %v5206_v13, inf }
 0x288   : > { %v1951_v50 = vmul.f32 %v3137_v23, %v5163_v5  ;;  %v3139_v18 = vpop.eup %3138  ;;  %3148 = vrsqrt.f32 %v1745_v26  ;;  %v1969_v12 = vand.u32 2147483648, %v5206_v13  ;;  %vm1968_vm10 = vcmp.eq.f32.partialorder %v5206_v13, 0.0 }
 0x289   : > { %v2169_v15 = vadd.f32 %v2137_v19, %v2000_v38  ;;  %v1944_v51 = vmul.f32 %v3139_v18, %v5185_v54  ;;  %v2001_v45 = vmul.f32 %v4522_v44, %v1935_v35  ;;  %v2206_v58 = vmul.f32 %v4515_v46, %v5127_v8 }
 0x28a   : > { %v1953_v33 = vsel %vm1952_vm6, %v5163_v5, %v1951_v50  ;;  %v3141_v42 = vpop.eup %3140  ;;  %vm1959_vm11 = vcmp.eq.f32.partialorder %v1745_v26, inf  ;;  %v1962_v2 = vand.u32 2147483648, %v1745_v26  ;;  %vm1961_vm12 = vcmp.eq.f32.partialorder %v1745_v26, 0.0 }
 0x28b   : > { %v2237_v21 = vadd.f32 %v2205_v10, %v2169_v15  ;;  %v1956_v39 = vsel %vm1954_vm7, %v1955_v9, %v1953_v33  ;;  %v2136_v24 = vmul.f32 %v3141_v42, %v4529_v36  ;;  %v1946_v5 = vsel %vm1945_vm4, %v5185_v54, %v1944_v51 }
 0x28c   : > { %v2041_v52 = vsel %vm2011_vm5, %v1956_v39, 0.0  ;;  %v3143_v31 = vpop.eup %3142  ;;  %v1949_v17 = vsel %vm1947_vm8, %v1948_v14, %v1946_v5  ;;  %v2207_v54 = vmul.f32 %v4515_v46, %v5082_v37  ;;  %v2004_v3 = vmul.f32 %v4522_v44, %v1956_v39 }
 0x28d   : > { %2269 = vst [vmem:[%s4607_s5 + $0xc8] sm:$0xff] %v2237_v21  ;;  %v2102_v7 = vmul.f32 1.442695, %v2041_v52  ;;  %v2168_v47 = vadd.f32 %v2136_v24, %v1999_v25  ;;  %v3145_v63 = vpop.eup %3144  ;;  %v2139_v22 = vmul.f32 %v3143_v31, %v4529_v36  ;;  %v2040_v48 = vsel %vm2011_vm5, %v1949_v17, 0.0 }
 0x28e   : > { %v2100_v11 = vmul.f32 1.442695, %v2040_v48  ;;  %v1965_v40 = vmul.f32 %v3145_v63, %v5206_v13  ;;  %v2209_v19 = vmul.f32 %v4515_v46, %v5154_v4  ;;  %v2003_v6 = vmul.f32 %v4522_v44, %v1949_v17 }
 0x28f   : > { %3150 = vpow2.f32 %v2102_v7  ;;  %v2236_v41 = vadd.f32 %v2204_v16, %v2168_v47  ;;  %v2171_v56 = vadd.f32 %v2139_v22, %v2002_v60  ;;  %v2211_v42 = vmul.f32 %v4515_v46, %v5188_v57 }
 0x290   : > { %3152 = vpow2.f32 %v2100_v11  ;;  %v1967_v29 = vsel %vm1966_vm9, %v5206_v13, %v1965_v40  ;;  %v2210_v24 = vmul.f32 %v4515_v46, %v5214_v61 }
 0x291   : > { %2268 = vst [vmem:[%s4607_s5 + $0xc0] sm:$0xff] %v2236_v41  ;;  %v3147_v53 = vpop.eup %3146  ;;  %v2239_v1 = vadd.f32 %v2207_v54, %v2171_v56  ;;  %v1970_v32 = vsel %vm1968_vm10, %v1969_v12, %v1967_v29 }
 0x292   : > { %v3149_v20 = vpop.eup %3148  ;;  %v2138_v0 = vmul.f32 %v3147_v53, %v4529_v36  ;;  %v2043_v37 = vsel %vm2011_vm5, %v1970_v32, 0.0  ;;  %v2006_v18 = vmul.f32 %v4522_v44, %v1970_v32 }
 0x293   : > { %2271 = vst [vmem:[%s4607_s5 + $0xd8] sm:$0xff] %v2239_v1  ;;  %v2106_v59 = vmul.f32 1.442695, %v2043_v37  ;;  %v1958_v28 = vmul.f32 %v3149_v20, %v1745_v26 }
 0x294   : > { %v2170_v43 = vadd.f32 %v2138_v0, %v2001_v45 }
 0x295   : > { %3154 = vpow2.f32 %v2106_v59  ;;  %v1960_v27 = vsel %vm1959_vm11, %v1745_v26, %v1958_v28  ;;  %v2208_v26 = vmul.f32 %v4515_v46, %v5166_v55 }
 0x296   : > { %v2238_v13 = vadd.f32 %v2206_v58, %v2170_v43  ;;  %v1963_v34 = vsel %vm1961_vm12, %v1962_v2, %v1960_v27 }
 0x297   : > { %v2042_v35 = vsel %vm2011_vm5, %v1963_v34, 0.0  ;;  %v2005_v25 = vmul.f32 %v4522_v44, %v1963_v34 }
 0x298   : > { %2270 = vst [vmem:[%s4607_s5 + $0xd0] sm:$0xff] %v2238_v13  ;;  %v2104_v8 = vmul.f32 1.442695, %v2042_v35 }
 0x299   : > { %v3151_v49 = vpop.eup %3150 }
 0x29a   : > { %v2141_v30 = vmul.f32 %v3151_v49, %v4529_v36  ;;  %v3153_v23 = vpop.eup %3152  ;;  %3156 = vpow2.f32 %v2104_v8 }
 0x29b   : > { %v2140_v62 = vmul.f32 %v3153_v23, %v4529_v36 }
 0x29c   : > { %v2173_v38 = vadd.f32 %v2141_v30, %v2004_v3 }
 0x29d   : > { %v2172_v50 = vadd.f32 %v2140_v62, %v2003_v6 }
 0x29e   : > { %v2241_v10 = vadd.f32 %v2209_v19, %v2173_v38 }
 0x29f   : > { %v3155_v15 = vpop.eup %3154  ;;  %v2240_v9 = vadd.f32 %v2208_v26, %v2172_v50 }
 0x2a0   : > { %2273 = vst [vmem:[%s4607_s5 + $0xe8] sm:$0xff] %v2241_v10  ;;  %v2143_v4 = vmul.f32 %v3155_v15, %v4529_v36 }
 0x2a1   : > { %2272 = vst [vmem:[%s4607_s5 + $0xe0] sm:$0xff] %v2240_v9 }
 0x2a2   : > { %v2175_v33 = vadd.f32 %v2143_v4, %v2006_v18 }
 0x2a4   : > { %v3157_v55 = vpop.eup %3156  ;;  %v2243_v21 = vadd.f32 %v2211_v42, %v2175_v33 }
 0x2a5   : > { %v2142_v39 = vmul.f32 %v3157_v55, %v4529_v36 }
 0x2a6   : > { %2275 = vst [vmem:[%s4607_s5 + $0xf8] sm:$0xff] %v2243_v21 }
 0x2a7   : > { %v2174_v51 = vadd.f32 %v2142_v39, %v2005_v25 }
 0x2a9   : > { %v2242_v44 = vadd.f32 %v2210_v24, %v2174_v51 }
 0x2ab   : > { %2274 = vst [vmem:[%s4607_s5 + $0xf0] sm:$0xff] %v2242_v44 }
 0x2ac   : > { %3172 = shalt.err (!%p3169_p7)
}
 0x2ad   : > { %s3173_s27 = scalar_lea.hbm %s5289_s12, 4096  ;;  %s3177_s8 = scalar_lea.hbm %s5352_s4, 24576 }
 0x2ae   : > { %p3174_p9 = scmp.ne.s32.totalorder %s5289_s12, %s3173_s27  ;;  %p3178_p12 = scmp.lt.u32.totalorder %s5289_s12, %s5352_s4 }
 0x2af   : > { %p3179_p13 = scmp.lt.u32.totalorder %s3177_s8, %s3173_s27  ;;  %p3181_p1 = scmp.lt.u32.totalorder %s3173_s27, %s5289_s12 }
 0x2b0   : > { %p3175_p10 = pnand %p3174_p9, %p3335_p3 }
 0x2b1   : > { %p3180_p0 = por %p3179_p13, %p3178_p12 }
 0x2b2   : > { %p3176_p11 = pneg %p3175_p10 }
 0x2b3   : > { %p3182_p2 = por %p3181_p1, %p3180_p0 }
 0x2b5   : > { %p3183_p4 = pnand %p3182_p2, %p3176_p11 }
 0x2b7   : > { %3186 = shalt.err (!%p3183_p4)
}
 0x2b8   : > { %s3257_s10 = smov 128   ;;  %s3258_s11 = smov 8  }
 0x2b9   : > { %2764 = dma.vmem_to_hbm [thread:$0]  (%p3335_p3), %s5291_s19, 4096, %s5289_s12, %s5296_s13, %s3257_s10, %s3257_s10, %s3258_s11  }
 0x2ba PF: > { %p2770_p5 = scmp.ge.s32.totalorder %s3253_s22, 2  ;;  %s2309_s14 = sand.u32 1, %s3225_s15  }
 0x2bb   : > { %s2310_s23 = scalar_lea.sflag [#allocation3], %s2309_s14 }
 0x2bc   : > { %p2767_p6 = pnand %p2770_p5, %p3344_p8 }
 0x2be   : > { %3220 = dma.done.wait (!%p2767_p6), %s2310_s23, 4096  }
 0x2bf   : > { %3222 = vsyncadd (!%p2767_p6), %s2310_s23, 4294963200  ;;  %s17_s22 = sadd.s32 1, %s3253_s22   ;;  %s5518_s15 = smov %s3229_s16 }
 0x2c0   : > { %p14_p7 = scmp.ge.s32.totalorder %s17_s22, 8   ;;  %s5519_s16 = smov %s3233_s17 }
 0x2c1   : > { %s5520_s17 = smov %s3353_s7  ;;  %s5521_s18 = smov %s3245_s20 }
 0x2c2   : > { %s5522_s19 = smov %s3249_s21  ;;  %s5523_s20 = smov %s5526_s25 }
 0x2c3   : > { %s5524_s21 = smov %s5530_s26  ;;  %16 = sbr.rel (!%p14_p7) target bundleno = 5 (0x5), region = 77 }
 0x2ca   :  { %2315 = vsyncpa [#allocation3], 1 }
 0x2cb   :  { %2317 = vsyncpa [#allocation3 + $0x1], 1 }

</bundles_post_ra>
